<compile_context>
chip_gen: v6e
topology: v6e:2x2x1
jax: 0.10.0
libtpu: 0.0.40
codegen_flags: <defaults>
</compile_context>

<pallas_src>
import functools

import jax
import jax.numpy as jnp
from jax import lax
from jax.experimental import pallas as pl
from jax.experimental.pallas import tpu as pltpu

EPS = 1e-12  # F.normalize default eps


def _round_up(x, m):
    return ((x + m - 1) // m) * m


def _choose_row_tile(n, d0, d1, tile_budget_bytes=24 * 1024 * 1024):
    """Row-tile height: multiple of 8, grown toward 2048 rows, capped so the
    double-buffered row tiles stay under a v7x-safe VMEM budget; keeps >= 2 grid
    steps when possible so the 'parallel' axis shards across 2 TensorCores."""
    # f32 bytes/row for pipelined tensors (x, packed noise, fused out), x2 buffers.
    bytes_per_row = 4 * (d0 + 2 * d1 + (2 * d1 + d0)) * 2
    cap = max(8, (tile_budget_bytes // bytes_per_row) // 8 * 8)
    n8 = _round_up(n, 8)
    tile = min(2048, cap, n8)
    if tile >= n8 and n8 > 8:
        # Whole batch would fit in one step: split into 2 so megacore can engage.
        tile = _round_up((n8 + 1) // 2, 8)
    return int(tile)


def _vmem_limit_bytes(tn, d0, d1):
    tile_bytes = 4 * tn * (d0 + 2 * d1 + (2 * d1 + d0)) * 2       # double-buffered tiles
    weight_bytes = 4 * (d0 * 2 * d1 + 2 * d1 + 2 * d1 * d0 + d0) * 2
    need = tile_bytes + weight_bytes + (4 << 20)
    # >= 32 MiB (raise small scoped defaults), <= 48 MiB (headroom under v7x's 64 MiB).
    return int(min(48 << 20, max(32 << 20, need)))


def _my_model_kernel(x_ref, *rest, d1, add_noise):
    if add_noise:
        noise_ref, w12_ref, b12_ref, wdp_ref, bd_ref, out_ref = rest
    else:
        w12_ref, b12_ref, wdp_ref, bd_ref, out_ref = rest

    x = x_ref[...]                                                     # (TN, D0)

    # Fused encoder: one MXU matmul computes both Linear layers.
    o12 = jnp.dot(x, w12_ref[...],
                  preferred_element_type=jnp.float32) + b12_ref[...]   # (TN, 2*D1)

    # Per-half row sum-of-squares without lane slicing:
    #   s_tot = sum(all lanes), s1 = sum(out1 lanes via mask), s2 = s_tot - s1.
    lane = lax.broadcasted_iota(jnp.int32, (1, 2 * d1), 1)
    mask1 = lane < d1                                                  # out1 lanes
    sq = o12 * o12
    s_tot = jnp.sum(sq, axis=1, keepdims=True)
    s1 = jnp.sum(jnp.where(mask1, sq, 0.0), axis=1, keepdims=True)
    s2 = s_tot - s1

    # F.normalize(dim=1, p=2): row * rsqrt(max(sumsq, eps^2)) == row / max(||row||, eps)
    inv1 = lax.rsqrt(jnp.maximum(s1, EPS * EPS))
    inv2 = lax.rsqrt(jnp.maximum(s2, EPS * EPS))
    inv_packed = jnp.where(mask1, inv1, inv2)                          # (TN, 2*D1) via bcast
    o12n = o12 * inv_packed

    if add_noise:
        # Noise pre-packed in the wrapper: zeros in out1 lanes, sigma*N(0,1) in out2 lanes.
        o12n = o12n + noise_ref[...]

    # Decoder folded into the packed path: wdp = 0.5 * [wd; wd]  =>
    #   o12n @ wdp == ((out1 + out2) / 2) @ wd
    dec = jnp.dot(o12n, wdp_ref[...],
                  preferred_element_type=jnp.float32) + bd_ref[...]    # (TN, D0)

    # Single fused, lane-denser store: [out1 | out2 | dec].
    out_ref[...] = jnp.concatenate([o12n, dec], axis=-1).astype(out_ref.dtype)


def my_model_forward(x, params, is_train=True, sigma=0.01, noise_key=None):
    """params: w1 (D0,D1), b1 (D1,), w2 (D0,D1), b2 (D1,), wd (D1,D0), bd (D0,)
    (weights stored pre-transposed as (in_features, out_features))."""
    n, d0 = x.shape
    d1 = params["w1"].shape[1]
    out_w = 2 * d1 + d0

    # Pack the two encoder layers -> single x @ [w1|w2] matmul; fold the 0.5 average
    # into the decoder weights -> packed K=2*D1 decoder matmul.
    w12 = jnp.concatenate([params["w1"], params["w2"]], axis=1)              # (D0, 2*D1)
    b12 = jnp.concatenate([params["b1"], params["b2"]]).reshape(1, 2 * d1)   # (1, 2*D1)
    wdp = 0.5 * jnp.concatenate([params["wd"], params["wd"]], axis=0)        # (2*D1, D0)
    bd = params["bd"].reshape(1, d0)                                         # (1, D0)

    tn = _choose_row_tile(n, d0, d1)
    grid = (pl.cdiv(n, tn),)
    add_noise = bool(is_train)

    inputs = [x]
    in_specs = [pl.BlockSpec((tn, d0), lambda i: (i, 0))]                    # x: row tiles
    if add_noise:
        if noise_key is None:
            noise_key = jax.random.PRNGKey(0)
        noise2 = (sigma * jax.random.normal(noise_key, (n, d1))).astype(jnp.float32)
        noise_packed = jnp.concatenate(
            [jnp.zeros((n, d1), jnp.float32), noise2], axis=1)               # (N, 2*D1)
        inputs.append(noise_packed)
        in_specs.append(pl.BlockSpec((tn, 2 * d1), lambda i: (i, 0)))        # noise: row tiles
    inputs += [w12, b12, wdp, bd]
    in_specs += [
        pl.BlockSpec((d0, 2 * d1), lambda i: (0, 0)),                        # enc weights (resident)
        pl.BlockSpec((1, 2 * d1), lambda i: (0, 0)),                         # enc bias
        pl.BlockSpec((2 * d1, d0), lambda i: (0, 0)),                        # packed dec weights
        pl.BlockSpec((1, d0), lambda i: (0, 0)),                             # dec bias
    ]

    flops = 2 * n * d0 * (2 * d1) + 2 * n * (2 * d1) * d0
    bytes_accessed = 4 * (n * d0 + (n * 2 * d1 if add_noise else 0)
                          + d0 * 2 * d1 + 2 * d1 + 2 * d1 * d0 + d0 + n * out_w)
    cost = pl.CostEstimate(flops=flops, transcendentals=2 * n,
                           bytes_accessed=bytes_accessed)

    fused = pl.pallas_call(
        functools.partial(_my_model_kernel, d1=d1, add_noise=add_noise),
        out_shape=jax.ShapeDtypeStruct((n, out_w), jnp.float32),
        grid=grid,
        in_specs=in_specs,
        out_specs=pl.BlockSpec((tn, out_w), lambda i: (i, 0)),               # [out1|out2|dec]
        compiler_params=pltpu.CompilerParams(
            dimension_semantics=("parallel",),                               # megacore / 2-TC sharding
            vmem_limit_bytes=_vmem_limit_bytes(tn, d0, d1),
        ),
        cost_estimate=cost,
    )(*inputs)

    out1 = fused[:, :d1]
    out2 = fused[:, d1:2 * d1]
    dec = fused[:, 2 * d1:]
    return out1, out2, dec


def init_params(key, dims):
    """Deterministic init mimicking nn.Linear (uniform(-1/sqrt(fan_in), 1/sqrt(fan_in)))."""
    d0, d1 = dims
    k1, k2, k3, k4, k5, k6 = jax.random.split(key, 6)
    lim1 = 1.0 / jnp.sqrt(d0)
    lim2 = 1.0 / jnp.sqrt(d1)
    return {
        "w1": jax.random.uniform(k1, (d0, d1), jnp.float32, -lim1, lim1),
        "b1": jax.random.uniform(k2, (d1,), jnp.float32, -lim1, lim1),
        "w2": jax.random.uniform(k3, (d0, d1), jnp.float32, -lim1, lim1),
        "b2": jax.random.uniform(k4, (d1,), jnp.float32, -lim1, lim1),
        "wd": jax.random.uniform(k5, (d1, d0), jnp.float32, -lim2, lim2),
        "bd": jax.random.uniform(k6, (d0,), jnp.float32, -lim2, lim2),
    }


if __name__ == "__main__":
    dims = [32, 16]          # [D0, D1]
    N = 1024                 # 2 row tiles of 512 -> exercises the grid + megacore axis

    root = jax.random.PRNGKey(0)
    k_param, k_x, k_noise = jax.random.split(root, 3)
    params = init_params(k_param, dims)
    x = jax.random.normal(k_x, (N, dims[0]), dtype=jnp.float32)

    # ---- pure-JAX reference (no noise) ----
    r1 = x @ params["w1"] + params["b1"]
    r2 = x @ params["w2"] + params["b2"]
    r1 = r1 / jnp.maximum(jnp.linalg.norm(r1, axis=1, keepdims=True), EPS)
    r2 = r2 / jnp.maximum(jnp.linalg.norm(r2, axis=1, keepdims=True), EPS)
    rd = ((r1 + r2) * 0.5) @ params["wd"] + params["bd"]

    # ---- eval mode: exact check ----
    out1_e, out2_e, dec_e = my_model_forward(x, params, is_train=False)
    jax.block_until_ready((out1_e, out2_e, dec_e))
    assert jnp.allclose(out1_e, r1, atol=1e-5)
    assert jnp.allclose(out2_e, r2, atol=1e-5)
    assert jnp.allclose(dec_e, rd, atol=1e-5)

    # ---- train mode: wrapper-generated noise; check structure & consistency ----
    out1_t, out2_t, dec_t = my_model_forward(x, params, is_train=True, sigma=0.01,
                                             noise_key=k_noise)
    jax.block_until_ready((out1_t, out2_t, dec_t))

    assert jnp.allclose(out1_t, r1, atol=1e-5)                   # out1 is noise-free
    noise = out2_t - r2
    assert float(jnp.max(jnp.abs(noise))) < 0.1                  # sigma=0.01-scale noise
    assert float(jnp.std(noise)) > 1e-4                          # noise actually applied
    rd_t = ((out1_t + out2_t) * 0.5) @ params["wd"] + params["bd"]
    assert jnp.allclose(dec_t, rd_t, atol=1e-4)                  # decoder consistent w/ noised out2

    print("KERNEL_OK")
</pallas_src>

<mosaic_0001>
module attributes {stable_mosaic.version = 11 : i64} {
  func.func @_my_model_kernel(%arg0: i32, %arg1: memref<512x32xf32, #tpu.memory_space<vmem>>, %arg2: memref<32x32xf32, #tpu.memory_space<vmem>>, %arg3: memref<1x32xf32, #tpu.memory_space<vmem>>, %arg4: memref<32x32xf32, #tpu.memory_space<vmem>>, %arg5: memref<1x32xf32, #tpu.memory_space<vmem>>, %arg6: memref<512x64xf32, #tpu.memory_space<vmem>>) attributes {dimension_semantics = [#tpu.dimension_semantics<parallel>], iteration_bounds = array<i64: 2>, scalar_prefetch = 0 : i64, scratch_operands = 0 : i64, tpu.core_type = #tpu.core_type<tc>, window_params = [{transform_indices = @transform_0, window_bounds = array<i64: 512, 32>}, {pipeline_mode = #tpu.pipeline_mode<synchronous>, transform_indices = @transform_1, window_bounds = array<i64: 32, 32>}, {pipeline_mode = #tpu.pipeline_mode<synchronous>, transform_indices = @transform_2, window_bounds = array<i64: 1, 32>}, {pipeline_mode = #tpu.pipeline_mode<synchronous>, transform_indices = @transform_3, window_bounds = array<i64: 32, 32>}, {pipeline_mode = #tpu.pipeline_mode<synchronous>, transform_indices = @transform_4, window_bounds = array<i64: 1, 32>}, {transform_indices = @transform_5, window_bounds = array<i64: 512, 64>}]} {
    %c0 = arith.constant 0 : index
    %c0_0 = arith.constant 0 : index
    %0 = vector.load %arg1[%c0, %c0_0] : memref<512x32xf32, #tpu.memory_space<vmem>>, vector<512x32xf32>
    %c0_1 = arith.constant 0 : index
    %c0_2 = arith.constant 0 : index
    %1 = vector.load %arg2[%c0_1, %c0_2] : memref<32x32xf32, #tpu.memory_space<vmem>>, vector<32x32xf32>
    %cst = arith.constant dense<0.000000e+00> : vector<512x32xf32>
    %2 = tpu.matmul %0, %1, %cst {dimension_numbers = #tpu.dot_dimension_numbers<[1], [0], [0], [1], [0, 0, 1, 1], [], []>} : vector<512x32xf32>, vector<32x32xf32>, vector<512x32xf32> -> vector<512x32xf32>
    %c0_3 = arith.constant 0 : index
    %c0_4 = arith.constant 0 : index
    %3 = vector.load %arg3[%c0_3, %c0_4] : memref<1x32xf32, #tpu.memory_space<vmem>>, vector<1x32xf32>
    %4 = vector.broadcast %3 : vector<1x32xf32> to vector<512x32xf32>
    %5 = arith.addf %2, %4 : vector<512x32xf32>
    %6 = tpu.iota {dimensions = array<i32: 1>} : vector<1x32xi32>
    %c16_i32 = arith.constant 16 : i32
    %7 = vector.broadcast %c16_i32 : i32 to vector<1x32xi32>
    %8 = arith.cmpi slt, %6, %7 : vector<1x32xi32>
    %9 = arith.mulf %5, %5 : vector<512x32xf32>
    %cst_5 = arith.constant dense<0.000000e+00> : vector<512xf32>
    %10 = vector.multi_reduction <add>, %9, %cst_5 [1] : vector<512x32xf32> to vector<512xf32>
    %11 = vector.shape_cast %10 : vector<512xf32> to vector<512x1xf32>
    %cst_6 = arith.constant 0.000000e+00 : f32
    %12 = vector.shape_cast %8 : vector<1x32xi1> to vector<1x32xi1>
    %13 = vector.broadcast %12 : vector<1x32xi1> to vector<512x32xi1>
    %14 = vector.broadcast %cst_6 : f32 to vector<512x32xf32>
    %15 = arith.select %13, %9, %14 : vector<512x32xi1>, vector<512x32xf32>
    %cst_7 = arith.constant dense<0.000000e+00> : vector<512xf32>
    %16 = vector.multi_reduction <add>, %15, %cst_7 [1] : vector<512x32xf32> to vector<512xf32>
    %17 = vector.shape_cast %16 : vector<512xf32> to vector<512x1xf32>
    %18 = arith.subf %11, %17 : vector<512x1xf32>
    %cst_8 = arith.constant 1.000000e-24 : f32
    %19 = vector.broadcast %cst_8 : f32 to vector<512x1xf32>
    %20 = arith.maximumf %17, %19 : vector<512x1xf32>
    %21 = math.rsqrt %20 : vector<512x1xf32>
    %cst_9 = arith.constant 1.000000e-24 : f32
    %22 = vector.broadcast %cst_9 : f32 to vector<512x1xf32>
    %23 = arith.maximumf %18, %22 : vector<512x1xf32>
    %24 = math.rsqrt %23 : vector<512x1xf32>
    %25 = vector.shape_cast %8 : vector<1x32xi1> to vector<1x32xi1>
    %26 = vector.broadcast %25 : vector<1x32xi1> to vector<512x32xi1>
    %27 = vector.shape_cast %21 : vector<512x1xf32> to vector<512x1xf32>
    %28 = vector.broadcast %27 : vector<512x1xf32> to vector<512x32xf32>
    %29 = vector.shape_cast %24 : vector<512x1xf32> to vector<512x1xf32>
    %30 = vector.broadcast %29 : vector<512x1xf32> to vector<512x32xf32>
    %31 = arith.select %26, %28, %30 : vector<512x32xi1>, vector<512x32xf32>
    %32 = arith.mulf %5, %31 : vector<512x32xf32>
    %c0_10 = arith.constant 0 : index
    %c0_11 = arith.constant 0 : index
    %33 = vector.load %arg4[%c0_10, %c0_11] : memref<32x32xf32, #tpu.memory_space<vmem>>, vector<32x32xf32>
    %cst_12 = arith.constant dense<0.000000e+00> : vector<512x32xf32>
    %34 = tpu.matmul %32, %33, %cst_12 {dimension_numbers = #tpu.dot_dimension_numbers<[1], [0], [0], [1], [0, 0, 1, 1], [], []>} : vector<512x32xf32>, vector<32x32xf32>, vector<512x32xf32> -> vector<512x32xf32>
    %c0_13 = arith.constant 0 : index
    %c0_14 = arith.constant 0 : index
    %35 = vector.load %arg5[%c0_13, %c0_14] : memref<1x32xf32, #tpu.memory_space<vmem>>, vector<1x32xf32>
    %36 = vector.broadcast %35 : vector<1x32xf32> to vector<512x32xf32>
    %37 = arith.addf %34, %36 : vector<512x32xf32>
    %38 = tpu.concatenate %32, %37 in 1 : vector<512x32xf32>, vector<512x32xf32> -> vector<512x64xf32>
    %c0_15 = arith.constant 0 : index
    %c0_16 = arith.constant 0 : index
    %39 = vector.load %arg6[%c0_15, %c0_16] : memref<512x64xf32, #tpu.memory_space<vmem>>, vector<512x64xf32>
    tpu.vector_store %arg6[%c0_15, %c0_16], %38 {strides = array<i32>} : memref<512x64xf32, #tpu.memory_space<vmem>>, vector<512x64xf32>,
    return
  }
  func.func @transform_0(%arg0: i32) -> (i32, i32) {
    %c0_i32 = arith.constant 0 : i32
    %c0_i32_0 = arith.constant 0 : i32
    return %arg0, %c0_i32 : i32, i32
  }
  func.func @transform_1(%arg0: i32) -> (i32, i32) {
    %c0_i32 = arith.constant 0 : i32
    %c0_i32_0 = arith.constant 0 : i32
    %c0_i32_1 = arith.constant 0 : i32
    return %c0_i32, %c0_i32_0 : i32, i32
  }
  func.func @transform_2(%arg0: i32) -> (i32, i32) {
    %c0_i32 = arith.constant 0 : i32
    %c0_i32_0 = arith.constant 0 : i32
    %c0_i32_1 = arith.constant 0 : i32
    return %c0_i32, %c0_i32_0 : i32, i32
  }
  func.func @transform_3(%arg0: i32) -> (i32, i32) {
    %c0_i32 = arith.constant 0 : i32
    %c0_i32_0 = arith.constant 0 : i32
    %c0_i32_1 = arith.constant 0 : i32
    return %c0_i32, %c0_i32_0 : i32, i32
  }
  func.func @transform_4(%arg0: i32) -> (i32, i32) {
    %c0_i32 = arith.constant 0 : i32
    %c0_i32_0 = arith.constant 0 : i32
    %c0_i32_1 = arith.constant 0 : i32
    return %c0_i32, %c0_i32_0 : i32, i32
  }
  func.func @transform_5(%arg0: i32) -> (i32, i32) {
    %c0_i32 = arith.constant 0 : i32
    %c0_i32_0 = arith.constant 0 : i32
    return %arg0, %c0_i32 : i32, i32
  }
}

</mosaic_0001>

<bundles_post_ra>
// kernel: tpu_custom_call.1
= control target key start
LH: loop header
LB: loop body
LE: loop exit
PB: predicated region body
PF: predicated region fallthrough
CT: control target
= control target key end

     0   :  { %s3665_s18 = smov 0   ;;  %s5271_s0 = inlined_call_operand.vmem [shape: f32[1024,32], index: 0, kind: input, shape index: {}]   ;;  %s5272_s1 = inlined_call_operand.vmem [shape: f32[32,32], index: 1, kind: input, shape index: {}]   ;;  %s5273_s2 = inlined_call_operand.vmem [shape: f32[1,32], index: 2, kind: input, shape index: {}]   ;;  %s5274_s3 = inlined_call_operand.vmem [shape: f32[32,32], index: 3, kind: input, shape index: {}]   ;;  %s5275_s4 = inlined_call_operand.vmem [shape: f32[1,32], index: 4, kind: input, shape index: {}]   ;;  %s5276_s5 = inlined_call_operand.vmem [shape: f32[1024,64], index: 5, kind: output, shape index: {}]  }
   0x1 LB: > { %s2875_s19 = sadd.s32 4294967295, %s3632_s18   ;;  %p2879_p0 = scmp.ge.s32.totalorder %s3632_s18, 1  ;;  %s3632_s18 = sphi %s3665_s18, %s15_s18  }
   0x2   : > { %p188_p1 = scmp.lt.s32.totalorder %s3632_s18, 3 }
   0x4   : > { %p189_p2 = pnand %p2879_p0, %p188_p1 }
   0x6   : > { %192 = sbr.rel (%p189_p2) target bundleno = 945 (0x3b1), region = 40 }
   0xb   : > { %v295_v0 = vld [vmem:[%s5272_s1 + $0x18] sm:$0xff]  ;;  %v294_v1 = vld [vmem:[%s5272_s1 + $0x10] sm:$0xff]  ;;  %s2880_s24 = sshll.u32 %s2875_s19, 6  ;;  %v293_v2 = vld [vmem:[%s5272_s1 + $0x8] sm:$0xff]  ;;  %vm303_vm0 = vcmask 261120   ;;  %s3634_s23 = smov 32  }
   0xc   : > { %3152 = vmatprep.subr.mxu0 %v295_v0  ;;  %p217_p3 = scmp.lt.s32.totalorder %s2880_s24, 127  ;;  %v292_v3 = vld [vmem:[%s5272_s1] sm:$0xff]  ;;  %vm2754_vm2 = vcmask 523264  }
   0xd   : > { %3153 = vmatpush3.msra.mxu0 %v295_v0 }
   0xe   : > { %3154 = vmatprep.subr.mxu0 %v294_v1  ;;  %s5347_s24 = smov (!%p217_p3, %s2880_s24), 127 }
   0xf   : > { %3155 = vmatpush3.msra.mxu0 %v294_v1  ;;  %s2881_s29 = sshll.u32 %s5347_s24, 3 }
  0x10   : > { %3156 = vmatprep.subr.mxu0 %v293_v2  ;;  %s3693_s7 = scalar_lea.vmem %s5271_s0, %s2881_s29  ;;  %s4941_s27 = scalar_lea.vmem %s5276_s5, %s2881_s29 }
  0x11   : > { %3157 = vmatpush3.msra.mxu0 %v293_v2  ;;  %v228_v4 = vld [vmem:[%s3693_s7] sm:$0xff]  ;;  %v229_v5 = vld [vmem:[%s3693_s7 + $0x8] sm:$0xff]  ;;  %v230_v6 = vld [vmem:[%s3693_s7 + $0x10] sm:$0xff] }
  0x12   : > { %3158 = vmatprep.subr.mxu0 %v292_v3  ;;  %3160 = vmatprep.mubr.msk.f32.mxu0 %vm303_vm0, %v228_v4  ;;  %v231_v7 = vld [vmem:[%s3693_s7 + $0x18] sm:$0xff]  ;;  %v232_v8 = vld [vmem:[%s3693_s7 + $0x20] sm:$0xff]  ;;  %v233_v9 = vld [vmem:[%s3693_s7 + $0x28] sm:$0xff]  ;;  %v881_v4 = vlaneseq }
  0x13   : > { %3159 = vmatpush3.msra.mxu0 %v292_v3  ;;  %v234_v10 = vld [vmem:[%s3693_s7 + $0x30] sm:$0xff]  ;;  %v235_v11 = vld [vmem:[%s3693_s7 + $0x38] sm:$0xff]  ;;  %v236_v12 = vld [vmem:[%s3693_s7 + $0x40] sm:$0xff] }
  0x14   : > { %3161 = vmatmul.mubr.msk.f32.vlgmr.msra.gmra.mxu0 %vm303_vm0, %v229_v5  ;;  %v237_v13 = vld [vmem:[%s3693_s7 + $0x48] sm:$0xff]  ;;  %v238_v14 = vld [vmem:[%s3693_s7 + $0x50] sm:$0xff]  ;;  %v239_v15 = vld [vmem:[%s3693_s7 + $0x58] sm:$0xff] }
  0x15   : > { %3163 = vmatprep.mubr.msk.f32.mxu0 %vm303_vm0, %v230_v6  ;;  %v240_v16 = vld [vmem:[%s3693_s7 + $0x60] sm:$0xff]  ;;  %v241_v17 = vld [vmem:[%s3693_s7 + $0x68] sm:$0xff]  ;;  %v242_v18 = vld [vmem:[%s3693_s7 + $0x70] sm:$0xff]  ;;  %v3828_v6 = vand.u32 127, %v881_v4 }
  0x16   : > { %v243_v19 = vld [vmem:[%s3693_s7 + $0x78] sm:$0xff]  ;;  %v244_v20 = vld [vmem:[%s3693_s7 + $0x80] sm:$0xff]  ;;  %v245_v21 = vld [vmem:[%s3693_s7 + $0x88] sm:$0xff] }
  0x17   : > { %v246_v22 = vld [vmem:[%s3693_s7 + $0x90] sm:$0xff]  ;;  %v247_v23 = vld [vmem:[%s3693_s7 + $0x98] sm:$0xff]  ;;  %v248_v24 = vld [vmem:[%s3693_s7 + $0xa0] sm:$0xff]  ;;  %vm883_vm1 = vcmp.lt.s32.totalorder %v3828_v6, 16 }
  0x18   : > { %3164 = vmatmul.mubr.msk.f32.gmra.mxu0 %vm303_vm0, %v231_v7  ;;  %v249_v25 = vld [vmem:[%s3693_s7 + $0xa8] sm:$0xff]  ;;  %v250_v26 = vld [vmem:[%s3693_s7 + $0xb0] sm:$0xff]  ;;  %v251_v27 = vld [vmem:[%s3693_s7 + $0xb8] sm:$0xff] }
  0x19   : > { %3166 = vmatprep.mubr.msk.f32.mxu0 %vm303_vm0, %v232_v8  ;;  %v252_v28 = vld [vmem:[%s3693_s7 + $0xc0] sm:$0xff]  ;;  %v253_v29 = vld [vmem:[%s3693_s7 + $0xc8] sm:$0xff]  ;;  %v254_v30 = vld [vmem:[%s3693_s7 + $0xd0] sm:$0xff] }
  0x1a   : > { %v255_v31 = vld [vmem:[%s3693_s7 + $0xd8] sm:$0xff]  ;;  %v256_v32 = vld [vmem:[%s3693_s7 + $0xe0] sm:$0xff]  ;;  %v257_v33 = vld [vmem:[%s3693_s7 + $0xe8] sm:$0xff] }
  0x1b   : > { %v258_v34 = vld [vmem:[%s3693_s7 + $0xf0] sm:$0xff]  ;;  %v259_v35 = vld [vmem:[%s3693_s7 + $0xf8] sm:$0xff]  ;;  %v260_v36 = vld [vmem:[%s3693_s7 + $0x100] sm:$0xff] }
  0x1c   : > { %3167 = vmatmul.mubr.msk.f32.gmra.mxu0 %vm303_vm0, %v233_v9  ;;  %v261_v37 = vld [vmem:[%s3693_s7 + $0x108] sm:$0xff]  ;;  %v262_v38 = vld [vmem:[%s3693_s7 + $0x110] sm:$0xff]  ;;  %v263_v39 = vld [vmem:[%s3693_s7 + $0x118] sm:$0xff] }
  0x1d   : > { %3169 = vmatprep.mubr.msk.f32.mxu0 %vm303_vm0, %v234_v10  ;;  %v264_v40 = vld [vmem:[%s3693_s7 + $0x120] sm:$0xff]  ;;  %v265_v41 = vld [vmem:[%s3693_s7 + $0x128] sm:$0xff]  ;;  %v266_v42 = vld [vmem:[%s3693_s7 + $0x130] sm:$0xff] }
  0x1e   : > { %v267_v43 = vld [vmem:[%s3693_s7 + $0x138] sm:$0xff]  ;;  %v268_v44 = vld [vmem:[%s3693_s7 + $0x140] sm:$0xff]  ;;  %v269_v45 = vld [vmem:[%s3693_s7 + $0x148] sm:$0xff] }
  0x1f   : > { %v270_v46 = vld [vmem:[%s3693_s7 + $0x150] sm:$0xff]  ;;  %v271_v47 = vld [vmem:[%s3693_s7 + $0x158] sm:$0xff]  ;;  %v272_v48 = vld [vmem:[%s3693_s7 + $0x160] sm:$0xff] }
  0x20   : > { %3170 = vmatmul.mubr.msk.f32.gmra.mxu0 %vm303_vm0, %v235_v11  ;;  %v273_v49 = vld [vmem:[%s3693_s7 + $0x168] sm:$0xff]  ;;  %v274_v50 = vld [vmem:[%s3693_s7 + $0x170] sm:$0xff]  ;;  %v275_v51 = vld [vmem:[%s3693_s7 + $0x178] sm:$0xff] }
  0x21   : > { %3172 = vmatprep.mubr.msk.f32.mxu0 %vm303_vm0, %v236_v12  ;;  %v276_v52 = vld [vmem:[%s3693_s7 + $0x180] sm:$0xff]  ;;  %v277_v53 = vld [vmem:[%s3693_s7 + $0x188] sm:$0xff]  ;;  %v278_v54 = vld [vmem:[%s3693_s7 + $0x190] sm:$0xff] }
  0x22   : > { %v279_v55 = vld [vmem:[%s3693_s7 + $0x198] sm:$0xff]  ;;  %v280_v56 = vld [vmem:[%s3693_s7 + $0x1a0] sm:$0xff]  ;;  %v281_v57 = vld [vmem:[%s3693_s7 + $0x1a8] sm:$0xff] }
  0x23   : > { %v282_v58 = vld [vmem:[%s3693_s7 + $0x1b0] sm:$0xff]  ;;  %v283_v59 = vld [vmem:[%s3693_s7 + $0x1b8] sm:$0xff]  ;;  %v284_v60 = vld [vmem:[%s3693_s7 + $0x1c0] sm:$0xff] }
  0x24   : > { %3173 = vmatmul.mubr.msk.f32.gmra.mxu0 %vm303_vm0, %v237_v13  ;;  %v285_v61 = vld [vmem:[%s3693_s7 + $0x1c8] sm:$0xff]  ;;  %v286_v62 = vld [vmem:[%s3693_s7 + $0x1d0] sm:$0xff]  ;;  %v287_v63 = vld [vmem:[%s3693_s7 + $0x1d8] sm:$0xff] }
  0x25   : > { %3175 = vmatprep.mubr.msk.f32.mxu0 %vm303_vm0, %v238_v14  ;;  %v288_v0 = vld [vmem:[%s3693_s7 + $0x1e0] sm:$0xff]  ;;  %v289_v1 = vld [vmem:[%s3693_s7 + $0x1e8] sm:$0xff]  ;;  %v290_v2 = vld [vmem:[%s3693_s7 + $0x1f0] sm:$0xff] }
  0x26   : > { %v291_v3 = vld [vmem:[%s3693_s7 + $0x1f8] sm:$0xff]  ;;  %v3826_v5 = vld [vmem:[%s5273_s2] ss:$0 sm:$0xff] }
  0x28   : > { %3176 = vmatmul.mubr.msk.f32.gmra.mxu0 %vm303_vm0, %v239_v15 }
  0x29   : > { %3178 = vmatprep.mubr.msk.f32.mxu0 %vm303_vm0, %v240_v16 }
  0x2c   : > { %3179 = vmatmul.mubr.msk.f32.gmra.mxu0 %vm303_vm0, %v241_v17 }
  0x2d   : > { %3181 = vmatprep.mubr.msk.f32.mxu0 %vm303_vm0, %v242_v18 }
  0x30   : > { %3182 = vmatmul.mubr.msk.f32.gmra.mxu0 %vm303_vm0, %v243_v19 }
  0x31   : > { %3184 = vmatprep.mubr.msk.f32.mxu0 %vm303_vm0, %v244_v20 }
  0x34   : > { %3185 = vmatmul.mubr.msk.f32.gmra.mxu0 %vm303_vm0, %v245_v21 }
  0x35   : > { %3187 = vmatprep.mubr.msk.f32.mxu0 %vm303_vm0, %v246_v22 }
  0x38   : > { %3188 = vmatmul.mubr.msk.f32.gmra.mxu0 %vm303_vm0, %v247_v23 }
  0x39   : > { %3190 = vmatprep.mubr.msk.f32.mxu0 %vm303_vm0, %v248_v24 }
  0x3c   : > { %3191 = vmatmul.mubr.msk.f32.gmra.mxu0 %vm303_vm0, %v249_v25 }
  0x3d   : > { %3193 = vmatprep.mubr.msk.f32.mxu0 %vm303_vm0, %v250_v26 }
  0x40   : > { %3194 = vmatmul.mubr.msk.f32.gmra.mxu0 %vm303_vm0, %v251_v27 }
  0x41   : > { %3196 = vmatprep.mubr.msk.f32.mxu0 %vm303_vm0, %v252_v28 }
  0x44   : > { %3197 = vmatmul.mubr.msk.f32.gmra.mxu0 %vm303_vm0, %v253_v29 }
  0x45   : > { %3199 = vmatprep.mubr.msk.f32.mxu0 %vm303_vm0, %v254_v30 }
  0x48   : > { %3200 = vmatmul.mubr.msk.f32.gmra.mxu0 %vm303_vm0, %v255_v31 }
  0x49   : > { %3202 = vmatprep.mubr.msk.f32.mxu0 %vm303_vm0, %v256_v32 }
  0x4c   : > { %3203 = vmatmul.mubr.msk.f32.gmra.mxu0 %vm303_vm0, %v257_v33 }
  0x4d   : > { %3205 = vmatprep.mubr.msk.f32.mxu0 %vm303_vm0, %v258_v34 }
  0x50   : > { %3206 = vmatmul.mubr.msk.f32.gmra.mxu0 %vm303_vm0, %v259_v35 }
  0x51   : > { %3208 = vmatprep.mubr.msk.f32.mxu0 %vm303_vm0, %v260_v36 }
  0x54   : > { %3209 = vmatmul.mubr.msk.f32.gmra.mxu0 %vm303_vm0, %v261_v37 }
  0x55   : > { %3211 = vmatprep.mubr.msk.f32.mxu0 %vm303_vm0, %v262_v38 }
  0x58   : > { %3212 = vmatmul.mubr.msk.f32.gmra.mxu0 %vm303_vm0, %v263_v39 }
  0x59   : > { %3214 = vmatprep.mubr.msk.f32.mxu0 %vm303_vm0, %v264_v40 }
  0x5c   : > { %3215 = vmatmul.mubr.msk.f32.gmra.mxu0 %vm303_vm0, %v265_v41 }
  0x5d   : > { %3217 = vmatprep.mubr.msk.f32.mxu0 %vm303_vm0, %v266_v42 }
  0x60   : > { %3218 = vmatmul.mubr.msk.f32.gmra.mxu0 %vm303_vm0, %v267_v43 }
  0x61   : > { %3220 = vmatprep.mubr.msk.f32.mxu0 %vm303_vm0, %v268_v44 }
  0x64   : > { %3221 = vmatmul.mubr.msk.f32.gmra.mxu0 %vm303_vm0, %v269_v45 }
  0x65   : > { %3223 = vmatprep.mubr.msk.f32.mxu0 %vm303_vm0, %v270_v46 }
  0x68   : > { %3224 = vmatmul.mubr.msk.f32.gmra.mxu0 %vm303_vm0, %v271_v47 }
  0x69   : > { %3226 = vmatprep.mubr.msk.f32.mxu0 %vm303_vm0, %v272_v48 }
  0x6c   : > { %3227 = vmatmul.mubr.msk.f32.gmra.mxu0 %vm303_vm0, %v273_v49 }
  0x6d   : > { %3229 = vmatprep.mubr.msk.f32.mxu0 %vm303_vm0, %v274_v50 }
  0x70   : > { %3230 = vmatmul.mubr.msk.f32.gmra.mxu0 %vm303_vm0, %v275_v51 }
  0x71   : > { %3232 = vmatprep.mubr.msk.f32.mxu0 %vm303_vm0, %v276_v52 }
  0x74   : > { %3233 = vmatmul.mubr.msk.f32.gmra.mxu0 %vm303_vm0, %v277_v53 }
  0x75   : > { %3235 = vmatprep.mubr.msk.f32.mxu0 %vm303_vm0, %v278_v54 }
  0x78   : > { %3236 = vmatmul.mubr.msk.f32.gmra.mxu0 %vm303_vm0, %v279_v55 }
  0x79   : > { %3238 = vmatprep.mubr.msk.f32.mxu0 %vm303_vm0, %v280_v56 }
  0x7c   : > { %3239 = vmatmul.mubr.msk.f32.gmra.mxu0 %vm303_vm0, %v281_v57 }
  0x7d   : > { %3241 = vmatprep.mubr.msk.f32.mxu0 %vm303_vm0, %v282_v58 }
  0x80   : > { %3242 = vmatmul.mubr.msk.f32.gmra.mxu0 %vm303_vm0, %v283_v59 }
  0x81   : > { %3244 = vmatprep.mubr.msk.f32.mxu0 %vm303_vm0, %v284_v60 }
  0x84   : > { %3245 = vmatmul.mubr.msk.f32.gmra.mxu0 %vm303_vm0, %v285_v61 }
  0x85   : > { %3247 = vmatprep.mubr.msk.f32.mxu0 %vm303_vm0, %v286_v62 }
  0x88   : > { %3248 = vmatmul.mubr.msk.f32.gmra.mxu0 %vm303_vm0, %v287_v63 }
  0x89   : > { %3250 = vmatprep.mubr.msk.f32.mxu0 %vm303_vm0, %v288_v0 }
  0x8c   : > { %3251 = vmatmul.mubr.msk.f32.gmra.mxu0 %vm303_vm0, %v289_v1 }
  0x8d   : > { %3253 = vmatprep.mubr.msk.f32.mxu0 %vm303_vm0, %v290_v2 }
  0x90   : > { %3254 = vmatmul.mubr.msk.f32.gmra.mxu0 %vm303_vm0, %v291_v3  ;;  %v1849_v3 = vld [vmem:[%s5274_s3 + $0x18] sm:$0xff] }
  0x91   : > { %3256 = vmatprep.subr.mxu1 %v1849_v3 }
  0x92   : > { %3257 = vmatpush3.msra.mxu1 %v1849_v3 }
  0xd4   : > { %v3162_v7 = vpop.f32.mrf.mxu0 }
  0xd5   : > { %v3831_v8 = vadd.f32 %v3162_v7, %v3826_v5 }
  0xd6   : > { %v562_v9 = vpop.f32.mrf.mxu0 }
  0xd7   : > { %v3834_v10 = vadd.f32 %v3826_v5, %v562_v9  ;;  %v885_v11 = vmul.f32 %v3831_v8, %v3831_v8 }
  0xd8   : > { %v3165_v12 = vpop.f32.mrf.mxu0 }
  0xd9   : > { %v951_v13 = vsel %vm303_vm0, %v885_v11, 0.0  ;;  %v3841_v14 = vadd.f32 %v3165_v12, %v3826_v5  ;;  %v884_v15 = vmul.f32 %v3834_v10, %v3834_v10  ;;  %v1143_v17 = vsel %vm883_vm1, %v885_v11, 0.0  ;;  %v1848_v12 = vld [vmem:[%s5274_s3 + $0x10] sm:$0xff] }
  0xda   : > { %952 = vadd.xlane.f32.xlu1 %v951_v13  ;;  %v572_v16 = vpop.f32.mrf.mxu0  ;;  %v1209_v23 = vsel %vm303_vm0, %v1143_v17, 0.0  ;;  %3258 = vmatprep.subr.mxu1 %v1848_v12 }
  0xdb   : > { %v887_v18 = vmul.f32 %v3841_v14, %v3841_v14  ;;  %v948_v19 = vsel %vm303_vm0, %v884_v15, 0.0  ;;  %v3851_v20 = vadd.f32 %v3826_v5, %v572_v16  ;;  %v1142_v21 = vsel %vm883_vm1, %v884_v15, 0.0  ;;  %3259 = vmatpush3.msra.mxu1 %v1848_v12  ;;  %v1847_v16 = vld [vmem:[%s5274_s3 + $0x8] sm:$0xff] }
  0xdc   : > { %949 = vadd.xlane.f32.xlu0 %v948_v19  ;;  %v3168_v22 = vpop.f32.mrf.mxu0  ;;  %v1206_v27 = vsel %vm303_vm0, %v1142_v21, 0.0  ;;  %3260 = vmatprep.subr.mxu1 %v1847_v16  ;;  %v1846_v19 = vld [vmem:[%s5274_s3] sm:$0xff] }
  0xdd   : > { %v1145_v24 = vsel %vm883_vm1, %v887_v18, 0.0  ;;  %v3859_v25 = vadd.f32 %v3168_v22, %v3826_v5  ;;  %v886_v26 = vmul.f32 %v3851_v20, %v3851_v20  ;;  %v957_v31 = vsel %vm303_vm0, %v887_v18, 0.0  ;;  %3261 = vmatpush3.msra.mxu1 %v1847_v16 }
  0xde   : > { %1210 = vadd.xlane.f32.xlu1 %v1209_v23  ;;  %v1215_v28 = vsel %vm303_vm0, %v1145_v24, 0.0  ;;  %v582_v29 = vpop.f32.mrf.mxu0  ;;  %3262 = vmatprep.subr.mxu1 %v1846_v19 }
  0xdf   : > { %v889_v30 = vmul.f32 %v3859_v25, %v3859_v25  ;;  %v3869_v33 = vadd.f32 %v3826_v5, %v582_v29  ;;  %v1144_v34 = vsel %vm883_vm1, %v886_v26, 0.0  ;;  %v954_v39 = vsel %vm303_vm0, %v886_v26, 0.0  ;;  %3263 = vmatpush3.msra.mxu1 %v1846_v19 }
  0xe0   : > { %1207 = vadd.xlane.f32.xlu0 %v1206_v27  ;;  %v3171_v32 = vpop.f32.mrf.mxu0  ;;  %v1212_v37 = vsel %vm303_vm0, %v1144_v34, 0.0 }
  0xe1   : > { %v1147_v35 = vsel %vm883_vm1, %v889_v30, 0.0  ;;  %v3876_v36 = vadd.f32 %v3171_v32, %v3826_v5  ;;  %v888_v38 = vmul.f32 %v3869_v33, %v3869_v33  ;;  %v963_v43 = vsel %vm303_vm0, %v889_v30, 0.0 }
  0xe2   : > { %1216 = vadd.xlane.f32.xlu1 %v1215_v28  ;;  %v1221_v40 = vsel %vm303_vm0, %v1147_v35, 0.0  ;;  %v592_v41 = vpop.f32.mrf.mxu0 }
  0xe3   : > { %v891_v42 = vmul.f32 %v3876_v36, %v3876_v36  ;;  %v3887_v45 = vadd.f32 %v3826_v5, %v592_v41  ;;  %v1146_v46 = vsel %vm883_vm1, %v888_v38, 0.0  ;;  %v960_v51 = vsel %vm303_vm0, %v888_v38, 0.0 }
  0xe4   : > { %958 = vadd.xlane.f32.xlu0 %v957_v31  ;;  %v3174_v44 = vpop.f32.mrf.mxu0  ;;  %v1218_v49 = vsel %vm303_vm0, %v1146_v46, 0.0 }
  0xe5   : > { %v1149_v47 = vsel %vm883_vm1, %v891_v42, 0.0  ;;  %v3894_v48 = vadd.f32 %v3174_v44, %v3826_v5  ;;  %v890_v50 = vmul.f32 %v3887_v45, %v3887_v45  ;;  %v969_v55 = vsel %vm303_vm0, %v891_v42, 0.0 }
  0xe6   : > { %1213 = vadd.xlane.f32.xlu1 %v1212_v37  ;;  %v1227_v52 = vsel %vm303_vm0, %v1149_v47, 0.0  ;;  %v602_v53 = vpop.f32.mrf.mxu0 }
  0xe7   : > { %v893_v54 = vmul.f32 %v3894_v48, %v3894_v48  ;;  %v3905_v57 = vadd.f32 %v3826_v5, %v602_v53  ;;  %v1148_v58 = vsel %vm883_vm1, %v890_v50, 0.0  ;;  %v966_v63 = vsel %vm303_vm0, %v890_v50, 0.0 }
  0xe8   : > { %955 = vadd.xlane.f32.xlu0 %v954_v39  ;;  %v3177_v56 = vpop.f32.mrf.mxu0  ;;  %v1224_v61 = vsel %vm303_vm0, %v1148_v58, 0.0 }
  0xe9   : > { %v1151_v59 = vsel %vm883_vm1, %v893_v54, 0.0  ;;  %v3912_v60 = vadd.f32 %v3177_v56, %v3826_v5  ;;  %v892_v62 = vmul.f32 %v3905_v57, %v3905_v57  ;;  %v975_v4 = vsel %vm303_vm0, %v893_v54, 0.0 }
  0xea   : > { %1222 = vadd.xlane.f32.xlu1 %v1221_v40  ;;  %v1233_v0 = vsel %vm303_vm0, %v1151_v59, 0.0  ;;  %v612_v1 = vpop.f32.mrf.mxu0 }
  0xeb   : > { %v895_v2 = vmul.f32 %v3912_v60, %v3912_v60  ;;  %v3926_v9 = vadd.f32 %v3826_v5, %v612_v1  ;;  %v1150_v11 = vsel %vm883_vm1, %v892_v62, 0.0  ;;  %v972_v21 = vsel %vm303_vm0, %v892_v62, 0.0 }
  0xec   : > { %964 = vadd.xlane.f32.xlu0 %v963_v43  ;;  %v3180_v7 = vpop.f32.mrf.mxu0  ;;  %v1230_v17 = vsel %vm303_vm0, %v1150_v11, 0.0 }
  0xed   : > { %v1153_v13 = vsel %vm883_vm1, %v895_v2, 0.0  ;;  %v3936_v15 = vadd.f32 %v3180_v7, %v3826_v5  ;;  %v894_v18 = vmul.f32 %v3926_v9, %v3926_v9  ;;  %v981_v26 = vsel %vm303_vm0, %v895_v2, 0.0 }
  0xee   : > { %1219 = vadd.xlane.f32.xlu1 %v1218_v49  ;;  %v1239_v22 = vsel %vm303_vm0, %v1153_v13, 0.0  ;;  %v622_v23 = vpop.f32.mrf.mxu0 }
  0xef   : > { %v897_v24 = vmul.f32 %v3936_v15, %v3936_v15  ;;  %v3953_v28 = vadd.f32 %v3826_v5, %v622_v23  ;;  %v1152_v29 = vsel %vm883_vm1, %v894_v18, 0.0  ;;  %v978_v35 = vsel %vm303_vm0, %v894_v18, 0.0 }
  0xf0   : > { %961 = vadd.xlane.f32.xlu0 %v960_v51  ;;  %v3183_v27 = vpop.f32.mrf.mxu0  ;;  %v1236_v32 = vsel %vm303_vm0, %v1152_v29, 0.0 }
  0xf1   : > { %v1155_v30 = vsel %vm883_vm1, %v897_v24, 0.0  ;;  %v3960_v31 = vadd.f32 %v3183_v27, %v3826_v5  ;;  %v896_v34 = vmul.f32 %v3953_v28, %v3953_v28  ;;  %v987_v40 = vsel %vm303_vm0, %v897_v24, 0.0 }
  0xf2   : > { %1228 = vadd.xlane.f32.xlu1 %v1227_v52  ;;  %v1245_v37 = vsel %vm303_vm0, %v1155_v30, 0.0  ;;  %v632_v38 = vpop.f32.mrf.mxu0 }
  0xf3   : > { %v899_v39 = vmul.f32 %v3960_v31, %v3960_v31  ;;  %v3971_v42 = vadd.f32 %v3826_v5, %v632_v38  ;;  %v1154_v43 = vsel %vm883_vm1, %v896_v34, 0.0  ;;  %v984_v50 = vsel %vm303_vm0, %v896_v34, 0.0 }
  0xf4   : > { %970 = vadd.xlane.f32.xlu0 %v969_v55  ;;  %v3186_v41 = vpop.f32.mrf.mxu0  ;;  %v1242_v47 = vsel %vm303_vm0, %v1154_v43, 0.0 }
  0xf5   : > { %v1157_v44 = vsel %vm883_vm1, %v899_v39, 0.0  ;;  %v3978_v46 = vadd.f32 %v3186_v41, %v3826_v5  ;;  %v898_v49 = vmul.f32 %v3971_v42, %v3971_v42  ;;  %v993_v54 = vsel %vm303_vm0, %v899_v39, 0.0 }
  0xf6   : > { %1225 = vadd.xlane.f32.xlu1 %v1224_v61  ;;  %v1251_v51 = vsel %vm303_vm0, %v1157_v44, 0.0  ;;  %v642_v52 = vpop.f32.mrf.mxu0 }
  0xf7   : > { %v901_v53 = vmul.f32 %v3978_v46, %v3978_v46  ;;  %v3989_v56 = vadd.f32 %v3826_v5, %v642_v52  ;;  %v1156_v58 = vsel %vm883_vm1, %v898_v49, 0.0 }
  0xf8   : > { %967 = vadd.xlane.f32.xlu0 %v966_v63  ;;  %v3189_v55 = vpop.f32.mrf.mxu0  ;;  %v1248_v62 = vsel %vm303_vm0, %v1156_v58, 0.0 }
  0xf9   : > { %v1159_v59 = vsel %vm883_vm1, %v901_v53, 0.0  ;;  %v3996_v61 = vadd.f32 %v3189_v55, %v3826_v5  ;;  %v900_v63 = vmul.f32 %v3989_v56, %v3989_v56 }
  0xfa   : > { %1234 = vadd.xlane.f32.xlu1 %v1233_v0  ;;  %v990_v0 = vsel %vm303_vm0, %v898_v49, 0.0  ;;  %v1257_v1 = vsel %vm303_vm0, %v1159_v59, 0.0  ;;  %v652_v2 = vpop.f32.mrf.mxu0 }
  0xfb   : > { %v903_v3 = vmul.f32 %v3996_v61, %v3996_v61  ;;  %v4007_v11 = vadd.f32 %v3826_v5, %v652_v2  ;;  %v1158_v12 = vsel %vm883_vm1, %v900_v63, 0.0  ;;  %v996_v19 = vsel %vm303_vm0, %v900_v63, 0.0 }
  0xfc   : > { %976 = vadd.xlane.f32.xlu0 %v975_v4  ;;  %v999_v4 = vsel %vm303_vm0, %v901_v53, 0.0  ;;  %v3192_v7 = vpop.f32.mrf.mxu0 }
  0xfd   : > { %v1161_v13 = vsel %vm883_vm1, %v903_v3, 0.0  ;;  %v4014_v16 = vadd.f32 %v3192_v7, %v3826_v5  ;;  %v902_v18 = vmul.f32 %v4007_v11, %v4007_v11  ;;  %v1005_v24 = vsel %vm303_vm0, %v903_v3, 0.0 }
  0xfe   : > { %1231 = vadd.xlane.f32.xlu1 %v1230_v17  ;;  %v1254_v17 = vsel %vm303_vm0, %v1158_v12, 0.0 }
  0xff   : > { %v905_v23 = vmul.f32 %v4014_v16, %v4014_v16  ;;  %v1160_v29 = vsel %vm883_vm1, %v902_v18, 0.0 }
 0x100   : > { %973 = vadd.xlane.f32.xlu0 %v972_v21  ;;  %v1263_v21 = vsel %vm303_vm0, %v1161_v13, 0.0  ;;  %v1260_v34 = vsel %vm303_vm0, %v1160_v29, 0.0 }
 0x101   : > { %v1163_v30 = vsel %vm883_vm1, %v905_v23, 0.0  ;;  %v1011_v41 = vsel %vm303_vm0, %v905_v23, 0.0 }
 0x102   : > { %1240 = vadd.xlane.f32.xlu1 %v1239_v22  ;;  %v662_v22 = vpop.f32.mrf.mxu0  ;;  %v1269_v38 = vsel %vm303_vm0, %v1163_v30, 0.0 }
 0x103   : > { %v4025_v27 = vadd.f32 %v3826_v5, %v662_v22 }
 0x104   : > { %982 = vadd.xlane.f32.xlu0 %v981_v26  ;;  %v3195_v26 = vpop.f32.mrf.mxu0 }
 0x106   : > { %1237 = vadd.xlane.f32.xlu1 %v1236_v32  ;;  %v4032_v32 = vadd.f32 %v3195_v26, %v3826_v5  ;;  %v672_v39 = vpop.f32.mrf.mxu0 }
 0x107   : > { %v4043_v44 = vadd.f32 %v3826_v5, %v672_v39 }
 0x108   : > { %979 = vadd.xlane.f32.xlu0 %v978_v35  ;;  %v904_v35 = vmul.f32 %v4025_v27, %v4025_v27  ;;  %v3198_v43 = vpop.f32.mrf.mxu0 }
 0x109   : > { %v906_v52 = vmul.f32 %v4043_v44, %v4043_v44 }
 0x10a   : > { %1246 = vadd.xlane.f32.xlu1 %v1245_v37  ;;  %v1002_v37 = vsel %vm303_vm0, %v902_v18, 0.0  ;;  %v1008_v53 = vsel %vm303_vm0, %v904_v35, 0.0  ;;  %v682_v55 = vpop.f32.mrf.mxu0 }
 0x10b   : > { %v4061_v63 = vadd.f32 %v3826_v5, %v682_v55  ;;  %v1014_v7 = vsel %vm303_vm0, %v906_v52, 0.0 }
 0x10c   : > { %988 = vadd.xlane.f32.xlu0 %v987_v40  ;;  %v907_v40 = vmul.f32 %v4032_v32, %v4032_v32 }
 0x10e   : > { %1243 = vadd.xlane.f32.xlu1 %v1242_v47  ;;  %v1162_v47 = vsel %vm883_vm1, %v904_v35, 0.0  ;;  %v1165_v49 = vsel %vm883_vm1, %v907_v40, 0.0  ;;  %v1017_v59 = vsel %vm303_vm0, %v907_v40, 0.0 }
 0x110   : > { %985 = vadd.xlane.f32.xlu0 %v984_v50  ;;  %v4050_v50 = vadd.f32 %v3198_v43, %v3826_v5 }
 0x112   : > { %1252 = vadd.xlane.f32.xlu1 %v1251_v51  ;;  %v1266_v51 = vsel %vm303_vm0, %v1162_v47, 0.0  ;;  %v909_v58 = vmul.f32 %v4050_v50, %v4050_v50 }
 0x114   : > { %994 = vadd.xlane.f32.xlu0 %v993_v54  ;;  %v1275_v54 = vsel %vm303_vm0, %v1165_v49, 0.0  ;;  %v1023_v18 = vsel %vm303_vm0, %v909_v58, 0.0 }
 0x116   : > { %1249 = vadd.xlane.f32.xlu1 %v1248_v62  ;;  %v3201_v62 = vpop.f32.mrf.mxu0 }
 0x117   : > { %v4068_v2 = vadd.f32 %v3201_v62, %v3826_v5 }
 0x118   : > { %991 = vadd.xlane.f32.xlu0 %v990_v0  ;;  %v1164_v0 = vsel %vm883_vm1, %v906_v52, 0.0  ;;  %v692_v13 = vpop.f32.mrf.mxu0 }
 0x119   : > { %v1272_v3 = vsel %vm303_vm0, %v1164_v0, 0.0 }
 0x11a   : > { %1258 = vadd.xlane.f32.xlu1 %v1257_v1  ;;  %v1167_v1 = vsel %vm883_vm1, %v909_v58, 0.0 }
 0x11b   : > { %v1281_v12 = vsel %vm303_vm0, %v1167_v1, 0.0 }
 0x11c   : > { %1000 = vadd.xlane.f32.xlu0 %v999_v4  ;;  %v908_v4 = vmul.f32 %v4061_v63, %v4061_v63 }
 0x11e   : > { %1255 = vadd.xlane.f32.xlu1 %v1254_v17  ;;  %v911_v17 = vmul.f32 %v4068_v2, %v4068_v2  ;;  %v1166_v22 = vsel %vm883_vm1, %v908_v4, 0.0  ;;  %v1020_v30 = vsel %vm303_vm0, %v908_v4, 0.0 }
 0x11f   : > { %v1278_v26 = vsel %vm303_vm0, %v1166_v22, 0.0 }
 0x120   : > { %997 = vadd.xlane.f32.xlu0 %v996_v19  ;;  %v3204_v19 = vpop.f32.mrf.mxu0  ;;  %v1169_v23 = vsel %vm883_vm1, %v911_v17, 0.0 }
 0x122   : > { %1264 = vadd.xlane.f32.xlu1 %v1263_v21  ;;  %v4079_v21 = vadd.f32 %v3826_v5, %v692_v13  ;;  %v702_v35 = vpop.f32.mrf.mxu0 }
 0x123   : > { %v4097_v40 = vadd.f32 %v3826_v5, %v702_v35 }
 0x124   : > { %1006 = vadd.xlane.f32.xlu0 %v1005_v24  ;;  %v4086_v24 = vadd.f32 %v3204_v19, %v3826_v5  ;;  %v910_v29 = vmul.f32 %v4079_v21, %v4079_v21  ;;  %v3207_v39 = vpop.f32.mrf.mxu0 }
 0x125   : > { %v4104_v47 = vadd.f32 %v3207_v39, %v3826_v5 }
 0x126   : > { %1261 = vadd.xlane.f32.xlu1 %v1260_v34  ;;  %v1287_v34 = vsel %vm303_vm0, %v1169_v23, 0.0  ;;  %v1026_v52 = vsel %vm303_vm0, %v910_v29, 0.0 }
 0x127   : > { %v915_v55 = vmul.f32 %v4104_v47, %v4104_v47 }
 0x128   : > { %1003 = vadd.xlane.f32.xlu0 %v1002_v37  ;;  %v913_v37 = vmul.f32 %v4086_v24, %v4086_v24 }
 0x129   : > { %v1173_v1 = vsel %vm883_vm1, %v915_v55, 0.0  ;;  %v1041_v19 = vsel %vm303_vm0, %v915_v55, 0.0 }
 0x12a   : > { %1270 = vadd.xlane.f32.xlu1 %v1269_v38  ;;  %v1029_v38 = vsel %vm303_vm0, %v911_v17, 0.0  ;;  %v1171_v43 = vsel %vm883_vm1, %v913_v37, 0.0  ;;  %v1035_v58 = vsel %vm303_vm0, %v913_v37, 0.0  ;;  %v1299_v13 = vsel %vm303_vm0, %v1173_v1, 0.0 }
 0x12c   : > { %1012 = vadd.xlane.f32.xlu0 %v1011_v41  ;;  %v1168_v41 = vsel %vm883_vm1, %v910_v29, 0.0 }
 0x12d   : > { %v1284_v49 = vsel %vm303_vm0, %v1168_v41, 0.0 }
 0x12e   : > { %1267 = vadd.xlane.f32.xlu1 %v1266_v51  ;;  %v912_v51 = vmul.f32 %v4097_v40, %v4097_v40 }
 0x130   : > { %1009 = vadd.xlane.f32.xlu0 %v1008_v53  ;;  %v1293_v53 = vsel %vm303_vm0, %v1171_v43, 0.0  ;;  %v1170_v0 = vsel %vm883_vm1, %v912_v51, 0.0 }
 0x131   : > { %v1290_v4 = vsel %vm303_vm0, %v1170_v0, 0.0 }
 0x132   : > { %1276 = vadd.xlane.f32.xlu1 %v1275_v54  ;;  %v712_v54 = vpop.f32.mrf.mxu0 }
 0x133   : > { %v4115_v62 = vadd.f32 %v3826_v5, %v712_v54 }
 0x134   : > { %1018 = vadd.xlane.f32.xlu0 %v1017_v59  ;;  %v3210_v59 = vpop.f32.mrf.mxu0 }
 0x136   : > { %1273 = vadd.xlane.f32.xlu1 %v1272_v3  ;;  %v4122_v3 = vadd.f32 %v3210_v59, %v3826_v5  ;;  %v722_v17 = vpop.f32.mrf.mxu0 }
 0x137   : > { %v4133_v23 = vadd.f32 %v3826_v5, %v722_v17 }
 0x138   : > { %1015 = vadd.xlane.f32.xlu0 %v1014_v7  ;;  %v914_v7 = vmul.f32 %v4115_v62, %v4115_v62  ;;  %v3213_v22 = vpop.f32.mrf.mxu0 }
 0x139   : > { %v916_v35 = vmul.f32 %v4133_v23, %v4133_v23 }
 0x13a   : > { %1282 = vadd.xlane.f32.xlu1 %v1281_v12  ;;  %v1032_v12 = vsel %vm303_vm0, %v912_v51, 0.0  ;;  %v1038_v37 = vsel %vm303_vm0, %v914_v7, 0.0  ;;  %v732_v39 = vpop.f32.mrf.mxu0 }
 0x13b   : > { %v4151_v51 = vadd.f32 %v3826_v5, %v732_v39  ;;  %v1044_v59 = vsel %vm303_vm0, %v916_v35, 0.0 }
 0x13c   : > { %1024 = vadd.xlane.f32.xlu0 %v1023_v18  ;;  %v917_v18 = vmul.f32 %v4122_v3, %v4122_v3 }
 0x13e   : > { %1279 = vadd.xlane.f32.xlu1 %v1278_v26  ;;  %v1172_v26 = vsel %vm883_vm1, %v914_v7, 0.0  ;;  %v1175_v29 = vsel %vm883_vm1, %v917_v18, 0.0  ;;  %v1047_v43 = vsel %vm303_vm0, %v917_v18, 0.0 }
 0x140   : > { %1021 = vadd.xlane.f32.xlu0 %v1020_v30  ;;  %v4140_v30 = vadd.f32 %v3213_v22, %v3826_v5 }
 0x142   : > { %1288 = vadd.xlane.f32.xlu1 %v1287_v34  ;;  %v1296_v34 = vsel %vm303_vm0, %v1172_v26, 0.0  ;;  %v919_v41 = vmul.f32 %v4140_v30, %v4140_v30 }
 0x144   : > { %1030 = vadd.xlane.f32.xlu0 %v1029_v38  ;;  %v1305_v38 = vsel %vm303_vm0, %v1175_v29, 0.0  ;;  %v1053_v7 = vsel %vm303_vm0, %v919_v41, 0.0 }
 0x146   : > { %1285 = vadd.xlane.f32.xlu1 %v1284_v49  ;;  %v3216_v49 = vpop.f32.mrf.mxu0 }
 0x147   : > { %v4158_v54 = vadd.f32 %v3216_v49, %v3826_v5 }
 0x148   : > { %1027 = vadd.xlane.f32.xlu0 %v1026_v52  ;;  %v1174_v52 = vsel %vm883_vm1, %v916_v35, 0.0  ;;  %v742_v1 = vpop.f32.mrf.mxu0 }
 0x149   : > { %v1302_v55 = vsel %vm303_vm0, %v1174_v52, 0.0 }
 0x14a   : > { %1294 = vadd.xlane.f32.xlu1 %v1293_v53  ;;  %v1177_v53 = vsel %vm883_vm1, %v919_v41, 0.0 }
 0x14b   : > { %v1311_v0 = vsel %vm303_vm0, %v1177_v53, 0.0 }
 0x14c   : > { %1036 = vadd.xlane.f32.xlu0 %v1035_v58  ;;  %v918_v58 = vmul.f32 %v4151_v51, %v4151_v51 }
 0x14e   : > { %1291 = vadd.xlane.f32.xlu1 %v1290_v4  ;;  %v921_v4 = vmul.f32 %v4158_v54, %v4158_v54  ;;  %v1176_v17 = vsel %vm883_vm1, %v918_v58, 0.0 }
 0x14f   : > { %v1308_v29 = vsel %vm303_vm0, %v1176_v17, 0.0 }
 0x150   : > { %1033 = vadd.xlane.f32.xlu0 %v1032_v12  ;;  %v3219_v12 = vpop.f32.mrf.mxu0  ;;  %v1059_v53 = vsel %vm303_vm0, %v921_v4, 0.0 }
 0x151   : > { %v4176_v22 = vadd.f32 %v3219_v12, %v3826_v5 }
 0x152   : > { %1300 = vadd.xlane.f32.xlu1 %v1299_v13  ;;  %v4169_v13 = vadd.f32 %v3826_v5, %v742_v1  ;;  %v752_v35 = vpop.f32.mrf.mxu0 }
 0x153   : > { %v923_v49 = vmul.f32 %v4176_v22, %v4176_v22 }
 0x154   : > { %1042 = vadd.xlane.f32.xlu0 %v1041_v19  ;;  %v1179_v19 = vsel %vm883_vm1, %v921_v4, 0.0 }
 0x155   : > { %v1317_v39 = vsel %vm303_vm0, %v1179_v19, 0.0 }
 0x156   : > { %1297 = vadd.xlane.f32.xlu1 %v1296_v34  ;;  %v920_v34 = vmul.f32 %v4169_v13, %v4169_v13 }
 0x158   : > { %1039 = vadd.xlane.f32.xlu0 %v1038_v37 }
 0x15a   : > { %1306 = vadd.xlane.f32.xlu1 %v1305_v38  ;;  %v1050_v38 = vsel %vm303_vm0, %v918_v58, 0.0  ;;  %v1178_v58 = vsel %vm883_vm1, %v920_v34, 0.0 }
 0x15c   : > { %1048 = vadd.xlane.f32.xlu0 %v1047_v43 }
 0x15e   : > { %1303 = vadd.xlane.f32.xlu1 %v1302_v55  ;;  %v4187_v55 = vadd.f32 %v3826_v5, %v752_v35 }
 0x160   : > { %1045 = vadd.xlane.f32.xlu0 %v1044_v59  ;;  %v3222_v59 = vpop.f32.mrf.mxu0 }
 0x161   : > { %v4194_v4 = vadd.f32 %v3222_v59, %v3826_v5 }
 0x162   : > { %1312 = vadd.xlane.f32.xlu1 %v1311_v0 }
 0x163   : > { %v953_v18 = vpop.xlane.xlu1 %952  ;;  %5300 = vst [vmem:[#allocation2_spill] sm:$0xff] %v4194_v4 }
 0x164   : > { %1054 = vadd.xlane.f32.xlu0 %v1053_v7 }
 0x165   : > { %v950_v26 = vpop.xlane.xlu0 %949 }
 0x166   : > { %1309 = vadd.xlane.f32.xlu1 %v1308_v29  ;;  %v922_v29 = vmul.f32 %v4187_v55, %v4187_v55 }
 0x167   : > { %v1211_v37 = vpop.xlane.xlu1 %1210 }
 0x168   : > { %v1399_v41 = vsub.f32 %v953_v18, %v1211_v37  ;;  %v1463_v43 = vmax.f32 %v1211_v37, 1e-24  ;;  %1051 = vadd.xlane.f32.xlu0 %v1050_v38  ;;  %v1181_v18 = vsel %vm883_vm1, %v923_v49, 0.0  ;;  %v1056_v38 = vsel %vm303_vm0, %v920_v34, 0.0 }
 0x169   : > { %v1208_v52 = vpop.xlane.xlu0 %1207  ;;  %v1180_v34 = vsel %vm883_vm1, %v922_v29, 0.0 }
 0x16a   : > { %v1591_v0 = vmax.f32 %v1399_v41, 1e-24  ;;  %v1398_v1 = vsub.f32 %v950_v26, %v1208_v52  ;;  %v1462_v7 = vmax.f32 %v1208_v52, 1e-24  ;;  %1318 = vadd.xlane.f32.xlu1 %v1317_v39  ;;  %3369 = vrsqrt.f32 %v1463_v43  ;;  %v762_v41 = vpop.f32.mrf.mxu0 }
 0x16b   : > { %v1217_v12 = vpop.xlane.xlu1 %1216  ;;  %v1314_v26 = vsel %vm303_vm0, %v1178_v58, 0.0  ;;  %v1323_v39 = vsel %vm303_vm0, %v1181_v18, 0.0 }
 0x16c   : > { %3371 = vrsqrt.f32 %v1591_v0  ;;  %v1590_v17 = vmax.f32 %v1398_v1, 1e-24  ;;  %1060 = vadd.xlane.f32.xlu0 %v1059_v53  ;;  %v1465_v43 = vmax.f32 %v1217_v12, 1e-24  ;;  %v925_v53 = vmul.f32 %v4194_v4, %v4194_v4 }
 0x16d   : > { %3373 = vrsqrt.f32 %v1462_v7  ;;  %v959_v19 = vpop.xlane.xlu0 %958  ;;  %v1065_v1 = vsel %vm303_vm0, %v923_v49, 0.0  ;;  %v3225_v7 = vpop.f32.mrf.mxu0 }
 0x16e   : > { %3375 = vrsqrt.f32 %v1590_v17  ;;  %v1401_v35 = vsub.f32 %v959_v19, %v1217_v12  ;;  %1315 = vadd.xlane.f32.xlu1 %v1314_v26  ;;  %v4205_v17 = vadd.f32 %v3826_v5, %v762_v41  ;;  %v1183_v19 = vsel %vm883_vm1, %v925_v53, 0.0 }
 0x16f   : > { %v1214_v37 = vpop.xlane.xlu1 %1213  ;;  %v4212_v26 = vadd.f32 %v3225_v7, %v3826_v5 }
 0x170   : > { %v1593_v52 = vmax.f32 %v1401_v35, 1e-24  ;;  %1057 = vadd.xlane.f32.xlu0 %v1056_v38  ;;  %v1464_v59 = vmax.f32 %v1214_v37, 1e-24  ;;  %5301 = vst [vmem:[#allocation3_spill] sm:$0xff] %v4205_v17  ;;  %v1320_v35 = vsel %vm303_vm0, %v1180_v34, 0.0 }
 0x171   : > { %v956_v0 = vpop.xlane.xlu0 %955  ;;  %5302 = vst [vmem:[#allocation4_spill] sm:$0xff] %v4212_v26 }
 0x172   : > { %v1400_v58 = vsub.f32 %v956_v0, %v1214_v37  ;;  %1324 = vadd.xlane.f32.xlu1 %v1323_v39  ;;  %3377 = vrsqrt.f32 %v1593_v52  ;;  %v924_v37 = vmul.f32 %v4205_v17, %v4205_v17  ;;  %v772_v39 = vpop.f32.mrf.mxu0  ;;  %v1329_v52 = vsel %vm303_vm0, %v1183_v19, 0.0 }
 0x173   : > { %v1223_v12 = vpop.xlane.xlu1 %1222  ;;  %3379 = vrsqrt.f32 %v1465_v43  ;;  %v1062_v43 = vsel %vm303_vm0, %v922_v29, 0.0  ;;  %v4223_v29 = vadd.f32 %v3826_v5, %v772_v39 }
 0x174   : > { %v1592_v18 = vmax.f32 %v1400_v58, 1e-24  ;;  %1066 = vadd.xlane.f32.xlu0 %v1065_v1  ;;  %3381 = vrsqrt.f32 %v1464_v59  ;;  %v1467_v1 = vmax.f32 %v1223_v12, 1e-24  ;;  %v927_v59 = vmul.f32 %v4212_v26, %v4212_v26  ;;  %v3228_v58 = vpop.f32.mrf.mxu0 }
 0x175   : > { %v965_v49 = vpop.xlane.xlu0 %964  ;;  %v4230_v26 = vadd.f32 %v3228_v58, %v3826_v5 }
 0x176   : > { %3383 = vrsqrt.f32 %v1592_v18  ;;  %v1403_v38 = vsub.f32 %v965_v49, %v1223_v12  ;;  %1321 = vadd.xlane.f32.xlu1 %v1320_v35  ;;  %v1071_v49 = vsel %vm303_vm0, %v925_v53, 0.0  ;;  %v1182_v12 = vsel %vm883_vm1, %v924_v37, 0.0 }
 0x177   : > { %v1220_v41 = vpop.xlane.xlu1 %1219  ;;  %v3370_v0 = vpop.eup %3369  ;;  %v1185_v39 = vsel %vm883_vm1, %v927_v59, 0.0 }
 0x178   : > { %v1595_v7 = vmax.f32 %v1403_v38, 1e-24  ;;  %1063 = vadd.xlane.f32.xlu0 %v1062_v43  ;;  %v1466_v18 = vmax.f32 %v1220_v41, 1e-24 }
 0x179   : > { %v3372_v34 = vpop.eup %3371  ;;  %v962_v4 = vpop.xlane.xlu0 %961 }
 0x17a   : > { %v3374_v35 = vpop.eup %3373  ;;  %v1402_v17 = vsub.f32 %v962_v4, %v1220_v41  ;;  %1330 = vadd.xlane.f32.xlu1 %v1329_v52  ;;  %3385 = vrsqrt.f32 %v1595_v7  ;;  %v1719_v43 = vsel %vm883_vm1, %v3370_v0, %v3372_v34  ;;  %v1326_v52 = vsel %vm303_vm0, %v1182_v12, 0.0 }
 0x17b   : > { %v3376_v19 = vpop.eup %3375  ;;  %v1229_v38 = vpop.xlane.xlu1 %1228  ;;  %3387 = vrsqrt.f32 %v1467_v1  ;;  %v926_v0 = vmul.f32 %v4223_v29, %v4223_v29  ;;  %v1068_v34 = vsel %vm303_vm0, %v924_v37, 0.0 }
 0x17c   : > { %v1594_v53 = vmax.f32 %v1402_v17, 1e-24  ;;  %1072 = vadd.xlane.f32.xlu0 %v1071_v49  ;;  %v1718_v4 = vsel %vm883_vm1, %v3374_v35, %v3376_v19  ;;  %3389 = vrsqrt.f32 %v1466_v18  ;;  %v4243_v17 = vmul.f32 %v1719_v43, %v3831_v8  ;;  %v782_v49 = vpop.f32.mrf.mxu0 }
 0x17d   : > { %v971_v41 = vpop.xlane.xlu0 %970  ;;  %v4238_v7 = vmul.f32 %v1718_v4, %v3834_v10  ;;  %v1335_v18 = vsel %vm303_vm0, %v1185_v39, 0.0  ;;  %v929_v10 = vmul.f32 %v4230_v26, %v4230_v26  ;;  %v1469_v12 = vmax.f32 %v1229_v38, 1e-24 }
 0x17e   : > { %3391 = vrsqrt.f32 %v1594_v53  ;;  %v1405_v1 = vsub.f32 %v971_v41, %v1229_v38  ;;  %1327 = vadd.xlane.f32.xlu1 %v1326_v52  ;;  %5304 = vst [vmem:[#allocation6_spill] sm:$0xff] %v4243_v17  ;;  %v1077_v4 = vsel %vm303_vm0, %v927_v59, 0.0  ;;  %v3231_v41 = vpop.f32.mrf.mxu0  ;;  %v4255_v39 = vadd.f32 %v3826_v5, %v782_v49 }
 0x17f   : > { %5303 = vst [vmem:[#allocation5_spill] sm:$0xff] %v4238_v7  ;;  %v1226_v58 = vpop.xlane.xlu1 %1225  ;;  %3264 = vmatprep.mubr.msk.f32.mxu1 %vm303_vm0, %v4238_v7  ;;  %v3378_v35 = vpop.eup %3377  ;;  %v1184_v38 = vsel %vm883_vm1, %v926_v0, 0.0 }
 0x180   : > { %v1597_v19 = vmax.f32 %v1405_v1, 1e-24  ;;  %1069 = vadd.xlane.f32.xlu0 %v1068_v34  ;;  %3265 = vmatmul.mubr.msk.f32.vlgmr.msra.gmra.mxu1 %vm303_vm0, %v4243_v17  ;;  %v3380_v8 = vpop.eup %3379  ;;  %v1468_v43 = vmax.f32 %v1226_v58, 1e-24  ;;  %v1187_v17 = vsel %vm883_vm1, %v929_v10, 0.0 }
 0x181   : > { %v968_v53 = vpop.xlane.xlu0 %967  ;;  %v3382_v37 = vpop.eup %3381  ;;  %v1721_v7 = vsel %vm883_vm1, %v3380_v8, %v3378_v35  ;;  %v928_v35 = vmul.f32 %v4255_v39, %v4255_v39 }
 0x182   : > { %v1404_v52 = vsub.f32 %v968_v53, %v1226_v58  ;;  %1336 = vadd.xlane.f32.xlu1 %v1335_v18  ;;  %3393 = vrsqrt.f32 %v1597_v19  ;;  %v4266_v18 = vadd.f32 %v3231_v41, %v3826_v5  ;;  %v1332_v19 = vsel %vm303_vm0, %v1184_v38, 0.0 }
 0x183   : > { %v3384_v1 = vpop.eup %3383  ;;  %v1235_v34 = vpop.xlane.xlu1 %1234  ;;  %3395 = vrsqrt.f32 %v1469_v12  ;;  %v4275_v8 = vmul.f32 %v1721_v7, %v3841_v14  ;;  %v1341_v41 = vsel %vm303_vm0, %v1187_v17, 0.0 }
 0x184   : > { %v1596_v59 = vmax.f32 %v1404_v52, 1e-24  ;;  %1078 = vadd.xlane.f32.xlu0 %v1077_v4  ;;  %v1720_v58 = vsel %vm883_vm1, %v3382_v37, %v3384_v1  ;;  %3397 = vrsqrt.f32 %v1468_v43  ;;  %v792_v4 = vpop.f32.mrf.mxu0  ;;  %v1074_v43 = vsel %vm303_vm0, %v926_v0, 0.0 }
 0x185   : > { %v977_v49 = vpop.xlane.xlu0 %976  ;;  %v4270_v53 = vmul.f32 %v1720_v58, %v3851_v20  ;;  %5306 = vst [vmem:[#allocation8_spill] sm:$0xff] %v4275_v8  ;;  %v1471_v52 = vmax.f32 %v1235_v34, 1e-24  ;;  %v931_v14 = vmul.f32 %v4266_v18, %v4266_v18  ;;  %v4287_v17 = vadd.f32 %v3826_v5, %v792_v4 }
 0x186   : > { %3399 = vrsqrt.f32 %v1596_v59  ;;  %v1407_v12 = vsub.f32 %v977_v49, %v1235_v34  ;;  %1333 = vadd.xlane.f32.xlu1 %v1332_v19  ;;  %v3234_v7 = vpop.f32.mrf.mxu0  ;;  %v1083_v49 = vsel %vm303_vm0, %v929_v10, 0.0  ;;  %v1186_v34 = vsel %vm883_vm1, %v928_v35, 0.0 }
 0x187   : > { %5305 = vst [vmem:[#allocation7_spill] sm:$0xff] %v4270_v53  ;;  %v1232_v37 = vpop.xlane.xlu1 %1231  ;;  %3267 = vmatprep.mubr.msk.f32.mxu1 %vm303_vm0, %v4270_v53  ;;  %v3386_v20 = vpop.eup %3385  ;;  %v1189_v4 = vsel %vm883_vm1, %v931_v14, 0.0 }
 0x188   : > { %v1599_v38 = vmax.f32 %v1407_v12, 1e-24  ;;  %1075 = vadd.xlane.f32.xlu0 %v1074_v43  ;;  %3268 = vmatmul.mubr.msk.f32.gmra.mxu1 %vm303_vm0, %v4275_v8  ;;  %v3388_v1 = vpop.eup %3387  ;;  %v1470_v59 = vmax.f32 %v1232_v37, 1e-24  ;;  %v4294_v8 = vadd.f32 %v3234_v7, %v3826_v5 }
 0x189   : > { %v974_v58 = vpop.xlane.xlu0 %973  ;;  %v3390_v19 = vpop.eup %3389  ;;  %v1723_v53 = vsel %vm883_vm1, %v3388_v1, %v3386_v20  ;;  %v930_v20 = vmul.f32 %v4287_v17, %v4287_v17 }
 0x18a   : > { %v1406_v0 = vsub.f32 %v974_v58, %v1232_v37  ;;  %1342 = vadd.xlane.f32.xlu1 %v1341_v41  ;;  %3401 = vrsqrt.f32 %v1599_v38  ;;  %v1338_v38 = vsel %vm303_vm0, %v1186_v34, 0.0  ;;  %v4307_v7 = vmul.f32 %v1723_v53, %v3859_v25 }
 0x18b   : > { %v3392_v12 = vpop.eup %3391  ;;  %v1241_v43 = vpop.xlane.xlu1 %1240  ;;  %3403 = vrsqrt.f32 %v1471_v52 }
 0x18c   : > { %v1598_v10 = vmax.f32 %v1406_v0, 1e-24  ;;  %1084 = vadd.xlane.f32.xlu0 %v1083_v49  ;;  %v1722_v37 = vsel %vm883_vm1, %v3390_v19, %v3392_v12  ;;  %3405 = vrsqrt.f32 %v1470_v59  ;;  %5308 = vst [vmem:[#allocation10_spill] sm:$0xff] %v4307_v7  ;;  %v1080_v59 = vsel %vm303_vm0, %v928_v35, 0.0  ;;  %v802_v19 = vpop.f32.mrf.mxu0 }
 0x18d   : > { %v983_v41 = vpop.xlane.xlu0 %982  ;;  %v4302_v58 = vmul.f32 %v1722_v37, %v3869_v33  ;;  %v1347_v49 = vsel %vm303_vm0, %v1189_v4, 0.0  ;;  %v933_v33 = vmul.f32 %v4294_v8, %v4294_v8  ;;  %v1473_v34 = vmax.f32 %v1241_v43, 1e-24 }
 0x18e   : > { %3407 = vrsqrt.f32 %v1598_v10  ;;  %v1409_v52 = vsub.f32 %v983_v41, %v1241_v43  ;;  %1339 = vadd.xlane.f32.xlu1 %v1338_v38  ;;  %v1089_v37 = vsel %vm303_vm0, %v931_v14, 0.0  ;;  %v3237_v41 = vpop.f32.mrf.mxu0  ;;  %v4319_v4 = vadd.f32 %v3826_v5, %v802_v19  ;;  %v4332_v5 = vld [vmem:[%s5273_s2] ss:$0 sm:$0xff] }
 0x18f   : > { %5307 = vst [vmem:[#allocation9_spill] sm:$0xff] %v4302_v58  ;;  %v1238_v1 = vpop.xlane.xlu1 %1237  ;;  %3270 = vmatprep.mubr.msk.f32.mxu1 %vm303_vm0, %v4302_v58  ;;  %v3394_v0 = vpop.eup %3393  ;;  %v1188_v43 = vsel %vm883_vm1, %v930_v20, 0.0 }
 0x190   : > { %v1601_v12 = vmax.f32 %v1409_v52, 1e-24  ;;  %1081 = vadd.xlane.f32.xlu0 %v1080_v59  ;;  %3271 = vmatmul.mubr.msk.f32.gmra.mxu1 %vm303_vm0, %v4307_v7  ;;  %v3396_v25 = vpop.eup %3395  ;;  %v1472_v53 = vmax.f32 %v1238_v1, 1e-24  ;;  %v1191_v7 = vsel %vm883_vm1, %v933_v33, 0.0 }
 0x191   : > { %v980_v10 = vpop.xlane.xlu0 %979  ;;  %v3398_v35 = vpop.eup %3397  ;;  %v1725_v58 = vsel %vm883_vm1, %v3396_v25, %v3394_v0  ;;  %v1344_v0 = vsel %vm303_vm0, %v1188_v43, 0.0 }
 0x192   : > { %v1408_v38 = vsub.f32 %v980_v10, %v1238_v1  ;;  %1348 = vadd.xlane.f32.xlu1 %v1347_v49  ;;  %3409 = vrsqrt.f32 %v1601_v12  ;;  %v4335_v49 = vadd.f32 %v4332_v5, %v3237_v41  ;;  %v4344_v10 = vmul.f32 %v1725_v58, %v3876_v36 }
 0x193   : > { %v3400_v52 = vpop.eup %3399  ;;  %v1247_v59 = vpop.xlane.xlu1 %1246  ;;  %3411 = vrsqrt.f32 %v1473_v34  ;;  %v932_v34 = vmul.f32 %v4319_v4, %v4319_v4  ;;  %v1353_v41 = vsel %vm303_vm0, %v1191_v7, 0.0 }
 0x194   : > { %v1600_v14 = vmax.f32 %v1408_v38, 1e-24  ;;  %1090 = vadd.xlane.f32.xlu0 %v1089_v37  ;;  %v1724_v1 = vsel %vm883_vm1, %v3398_v35, %v3400_v52  ;;  %3413 = vrsqrt.f32 %v1472_v53  ;;  %5310 = vst [vmem:[#allocation12_spill] sm:$0xff] %v4344_v10  ;;  %v812_v37 = vpop.f32.mrf.mxu0  ;;  %v1086_v53 = vsel %vm303_vm0, %v930_v20, 0.0 }
 0x195   : > { %v989_v19 = vpop.xlane.xlu0 %988  ;;  %v4339_v12 = vmul.f32 %v1724_v1, %v3887_v45  ;;  %v1475_v38 = vmax.f32 %v1247_v59, 1e-24  ;;  %v935_v36 = vmul.f32 %v4335_v49, %v4335_v49  ;;  %v4356_v7 = vadd.f32 %v4332_v5, %v812_v37 }
 0x196   : > { %3415 = vrsqrt.f32 %v1600_v14  ;;  %v1411_v25 = vsub.f32 %v989_v19, %v1247_v59  ;;  %1345 = vadd.xlane.f32.xlu1 %v1344_v0  ;;  %v3240_v58 = vpop.f32.mrf.mxu0  ;;  %v1095_v19 = vsel %vm303_vm0, %v933_v33, 0.0  ;;  %v1190_v59 = vsel %vm883_vm1, %v932_v34, 0.0 }
 0x197   : > { %5309 = vst [vmem:[#allocation11_spill] sm:$0xff] %v4339_v12  ;;  %v1244_v35 = vpop.xlane.xlu1 %1243  ;;  %3273 = vmatprep.mubr.msk.f32.mxu1 %vm303_vm0, %v4339_v12  ;;  %v3402_v45 = vpop.eup %3401  ;;  %v1193_v37 = vsel %vm883_vm1, %v935_v36, 0.0 }
 0x198   : > { %v1603_v43 = vmax.f32 %v1411_v25, 1e-24  ;;  %1087 = vadd.xlane.f32.xlu0 %v1086_v53  ;;  %3274 = vmatmul.mubr.msk.f32.gmra.mxu1 %vm303_vm0, %v4344_v10  ;;  %v3404_v52 = vpop.eup %3403  ;;  %v1474_v14 = vmax.f32 %v1244_v35, 1e-24  ;;  %v4363_v10 = vadd.f32 %v4332_v5, %v3240_v58 }
 0x199   : > { %v986_v1 = vpop.xlane.xlu0 %985  ;;  %v3406_v0 = vpop.eup %3405  ;;  %v1727_v12 = vsel %vm883_vm1, %v3404_v52, %v3402_v45  ;;  %v934_v45 = vmul.f32 %v4356_v7, %v4356_v7 }
 0x19a   : > { %v1410_v20 = vsub.f32 %v986_v1, %v1244_v35  ;;  %1354 = vadd.xlane.f32.xlu1 %v1353_v41  ;;  %3417 = vrsqrt.f32 %v1603_v43  ;;  %v1350_v43 = vsel %vm303_vm0, %v1190_v59, 0.0  ;;  %v4376_v58 = vmul.f32 %v1727_v12, %v3894_v48 }
 0x19b   : > { %v3408_v25 = vpop.eup %3407  ;;  %v1253_v53 = vpop.xlane.xlu1 %1252  ;;  %3419 = vrsqrt.f32 %v1475_v38 }
 0x19c   : > { %v1602_v33 = vmax.f32 %v1410_v20, 1e-24  ;;  %1096 = vadd.xlane.f32.xlu0 %v1095_v19  ;;  %v1726_v35 = vsel %vm883_vm1, %v3406_v0, %v3408_v25  ;;  %3421 = vrsqrt.f32 %v1474_v14  ;;  %5312 = vst [vmem:[#allocation14_spill] sm:$0xff] %v4376_v58  ;;  %v1092_v14 = vsel %vm303_vm0, %v932_v34, 0.0  ;;  %v822_v0 = vpop.f32.mrf.mxu0 }
 0x19d   : > { %v995_v41 = vpop.xlane.xlu0 %994  ;;  %v4371_v1 = vmul.f32 %v1726_v35, %v3905_v57  ;;  %v1359_v19 = vsel %vm303_vm0, %v1193_v37, 0.0  ;;  %v937_v57 = vmul.f32 %v4363_v10, %v4363_v10  ;;  %v1477_v59 = vmax.f32 %v1253_v53, 1e-24 }
 0x19e   : > { %3423 = vrsqrt.f32 %v1602_v33  ;;  %v1413_v38 = vsub.f32 %v995_v41, %v1253_v53  ;;  %1351 = vadd.xlane.f32.xlu1 %v1350_v43  ;;  %v1101_v35 = vsel %vm303_vm0, %v935_v36, 0.0  ;;  %v3243_v41 = vpop.f32.mrf.mxu0  ;;  %v4388_v37 = vadd.f32 %v4332_v5, %v822_v0 }
 0x19f   : > { %5311 = vst [vmem:[#allocation13_spill] sm:$0xff] %v4371_v1  ;;  %v1250_v52 = vpop.xlane.xlu1 %1249  ;;  %3276 = vmatprep.mubr.msk.f32.mxu1 %vm303_vm0, %v4371_v1  ;;  %v3410_v20 = vpop.eup %3409  ;;  %v1192_v53 = vsel %vm883_vm1, %v934_v45, 0.0 }
 0x1a0   : > { %v1605_v25 = vmax.f32 %v1413_v38, 1e-24  ;;  %1093 = vadd.xlane.f32.xlu0 %v1092_v14  ;;  %3277 = vmatmul.mubr.msk.f32.gmra.mxu1 %vm303_vm0, %v4376_v58  ;;  %v3412_v48 = vpop.eup %3411  ;;  %v1476_v12 = vmax.f32 %v1250_v52, 1e-24  ;;  %v1195_v58 = vsel %vm883_vm1, %v937_v57, 0.0 }
 0x1a1   : > { %v992_v33 = vpop.xlane.xlu0 %991  ;;  %v3414_v34 = vpop.eup %3413  ;;  %v1729_v1 = vsel %vm883_vm1, %v3412_v48, %v3410_v20  ;;  %v936_v20 = vmul.f32 %v4388_v37, %v4388_v37 }
 0x1a2   : > { %v1412_v43 = vsub.f32 %v992_v33, %v1250_v52  ;;  %1360 = vadd.xlane.f32.xlu1 %v1359_v19  ;;  %3425 = vrsqrt.f32 %v1605_v25  ;;  %v4399_v19 = vadd.f32 %v4332_v5, %v3243_v41  ;;  %v1356_v25 = vsel %vm303_vm0, %v1192_v53, 0.0 }
 0x1a3   : > { %v3416_v38 = vpop.eup %3415  ;;  %v1259_v14 = vpop.xlane.xlu1 %1258  ;;  %3427 = vrsqrt.f32 %v1477_v59  ;;  %v4408_v48 = vmul.f32 %v1729_v1, %v3912_v60  ;;  %v1365_v41 = vsel %vm303_vm0, %v1195_v58, 0.0 }
 0x1a4   : > { %v1604_v36 = vmax.f32 %v1412_v43, 1e-24  ;;  %1102 = vadd.xlane.f32.xlu0 %v1101_v35  ;;  %v1728_v52 = vsel %vm883_vm1, %v3414_v34, %v3416_v38  ;;  %3429 = vrsqrt.f32 %v1476_v12  ;;  %v832_v35 = vpop.f32.mrf.mxu0  ;;  %v1098_v12 = vsel %vm303_vm0, %v934_v45, 0.0 }
 0x1a5   : > { %v1001_v0 = vpop.xlane.xlu0 %1000  ;;  %v4403_v33 = vmul.f32 %v1728_v52, %v3926_v9  ;;  %5314 = vst [vmem:[#allocation16_spill] sm:$0xff] %v4408_v48  ;;  %v1479_v43 = vmax.f32 %v1259_v14, 1e-24  ;;  %v939_v60 = vmul.f32 %v4399_v19, %v4399_v19  ;;  %v4420_v58 = vadd.f32 %v4332_v5, %v832_v35 }
 0x1a6   : > { %3431 = vrsqrt.f32 %v1604_v36  ;;  %v1415_v59 = vsub.f32 %v1001_v0, %v1259_v14  ;;  %1357 = vadd.xlane.f32.xlu1 %v1356_v25  ;;  %v3246_v1 = vpop.f32.mrf.mxu0  ;;  %v1107_v0 = vsel %vm303_vm0, %v937_v57, 0.0  ;;  %v1194_v14 = vsel %vm883_vm1, %v936_v20, 0.0 }
 0x1a7   : > { %5313 = vst [vmem:[#allocation15_spill] sm:$0xff] %v4403_v33  ;;  %v1256_v34 = vpop.xlane.xlu1 %1255  ;;  %3279 = vmatprep.mubr.msk.f32.mxu1 %vm303_vm0, %v4403_v33  ;;  %v3418_v9 = vpop.eup %3417  ;;  %v1197_v35 = vsel %vm883_vm1, %v939_v60, 0.0 }
 0x1a8   : > { %v1607_v53 = vmax.f32 %v1415_v59, 1e-24  ;;  %1099 = vadd.xlane.f32.xlu0 %v1098_v12  ;;  %3280 = vmatmul.mubr.msk.f32.gmra.mxu1 %vm303_vm0, %v4408_v48  ;;  %v3420_v38 = vpop.eup %3419  ;;  %v1478_v36 = vmax.f32 %v1256_v34, 1e-24  ;;  %v4427_v48 = vadd.f32 %v4332_v5, %v3246_v1 }
 0x1a9   : > { %v998_v52 = vpop.xlane.xlu0 %997  ;;  %v3422_v25 = vpop.eup %3421  ;;  %v1731_v33 = vsel %vm883_vm1, %v3420_v38, %v3418_v9  ;;  %v938_v9 = vmul.f32 %v4420_v58, %v4420_v58 }
 0x1aa   : > { %v1414_v45 = vsub.f32 %v998_v52, %v1256_v34  ;;  %1366 = vadd.xlane.f32.xlu1 %v1365_v41  ;;  %3433 = vrsqrt.f32 %v1607_v53  ;;  %v1362_v53 = vsel %vm303_vm0, %v1194_v14, 0.0  ;;  %v4440_v1 = vmul.f32 %v1731_v33, %v3936_v15 }
 0x1ab   : > { %v3424_v59 = vpop.eup %3423  ;;  %v1265_v12 = vpop.xlane.xlu1 %1264  ;;  %3435 = vrsqrt.f32 %v1479_v43 }
 0x1ac   : > { %v1606_v57 = vmax.f32 %v1414_v45, 1e-24  ;;  %1108 = vadd.xlane.f32.xlu0 %v1107_v0  ;;  %v1730_v34 = vsel %vm883_vm1, %v3422_v25, %v3424_v59  ;;  %3437 = vrsqrt.f32 %v1478_v36  ;;  %5316 = vst [vmem:[#allocation18_spill] sm:$0xff] %v4440_v1  ;;  %v1104_v36 = vsel %vm303_vm0, %v936_v20, 0.0  ;;  %v842_v25 = vpop.f32.mrf.mxu0 }
 0x1ad   : > { %v1007_v41 = vpop.xlane.xlu0 %1006  ;;  %v4435_v52 = vmul.f32 %v1730_v34, %v3953_v28  ;;  %v1371_v0 = vsel %vm303_vm0, %v1197_v35, 0.0  ;;  %v941_v28 = vmul.f32 %v4427_v48, %v4427_v48  ;;  %v1481_v14 = vmax.f32 %v1265_v12, 1e-24 }
 0x1ae   : > { %3439 = vrsqrt.f32 %v1606_v57  ;;  %v1417_v43 = vsub.f32 %v1007_v41, %v1265_v12  ;;  %1363 = vadd.xlane.f32.xlu1 %v1362_v53  ;;  %v1113_v34 = vsel %vm303_vm0, %v939_v60, 0.0  ;;  %v3249_v41 = vpop.f32.mrf.mxu0  ;;  %v4452_v35 = vadd.f32 %v4332_v5, %v842_v25 }
 0x1af   : > { %5315 = vst [vmem:[#allocation17_spill] sm:$0xff] %v4435_v52  ;;  %v1262_v38 = vpop.xlane.xlu1 %1261  ;;  %3282 = vmatprep.mubr.msk.f32.mxu1 %vm303_vm0, %v4435_v52  ;;  %v3426_v45 = vpop.eup %3425  ;;  %v1196_v12 = vsel %vm883_vm1, %v938_v9, 0.0 }
 0x1b0   : > { %v1609_v59 = vmax.f32 %v1417_v43, 1e-24  ;;  %1105 = vadd.xlane.f32.xlu0 %v1104_v36  ;;  %3283 = vmatmul.mubr.msk.f32.gmra.mxu1 %vm303_vm0, %v4440_v1  ;;  %v3428_v15 = vpop.eup %3427  ;;  %v1480_v33 = vmax.f32 %v1262_v38, 1e-24  ;;  %v1199_v1 = vsel %vm883_vm1, %v941_v28, 0.0 }
 0x1b1   : > { %v1004_v57 = vpop.xlane.xlu0 %1003  ;;  %v3430_v20 = vpop.eup %3429  ;;  %v1733_v52 = vsel %vm883_vm1, %v3428_v15, %v3426_v45 }
 0x1b2   : > { %v1416_v53 = vsub.f32 %v1004_v57, %v1262_v38  ;;  %1372 = vadd.xlane.f32.xlu1 %v1371_v0  ;;  %3441 = vrsqrt.f32 %v1609_v59  ;;  %v4463_v0 = vadd.f32 %v4332_v5, %v3249_v41  ;;  %v1368_v59 = vsel %vm303_vm0, %v1196_v12, 0.0  ;;  %v852_v45 = vpop.f32.mrf.mxu0 }
 0x1b3   : > { %v3432_v43 = vpop.eup %3431  ;;  %v1271_v36 = vpop.xlane.xlu1 %1270  ;;  %3443 = vrsqrt.f32 %v1481_v14  ;;  %v940_v14 = vmul.f32 %v4452_v35, %v4452_v35  ;;  %v1377_v41 = vsel %vm303_vm0, %v1199_v1, 0.0  ;;  %v4484_v1 = vadd.f32 %v4332_v5, %v852_v45 }
 0x1b4   : > { %v1608_v60 = vmax.f32 %v1416_v53, 1e-24  ;;  %1114 = vadd.xlane.f32.xlu0 %v1113_v34  ;;  %v1732_v38 = vsel %vm883_vm1, %v3430_v20, %v3432_v43  ;;  %5317 = vst [vmem:[#allocation19_spill] sm:$0xff] %v4463_v0  ;;  %3445 = vrsqrt.f32 %v1480_v33  ;;  %v4472_v34 = vmul.f32 %v1733_v52, %v3960_v31 }
 0x1b5   : > { %v1013_v25 = vpop.xlane.xlu0 %1012  ;;  %v4467_v57 = vmul.f32 %v1732_v38, %v3971_v42  ;;  %v1110_v33 = vsel %vm303_vm0, %v938_v9, 0.0  ;;  %v3252_v42 = vpop.f32.mrf.mxu0  ;;  %v1483_v12 = vmax.f32 %v1271_v36, 1e-24  ;;  %v943_v31 = vmul.f32 %v4463_v0, %v4463_v0 }
 0x1b6   : > { %3447 = vrsqrt.f32 %v1608_v60  ;;  %v1419_v15 = vsub.f32 %v1013_v25, %v1271_v36  ;;  %1369 = vadd.xlane.f32.xlu1 %v1368_v59  ;;  %5319 = vst [vmem:[#allocation21_spill] sm:$0xff] %v4472_v34  ;;  %v1119_v25 = vsel %vm303_vm0, %v941_v28, 0.0  ;;  %v1198_v36 = vsel %vm883_vm1, %v940_v14, 0.0 }
 0x1b7   : > { %5318 = vst [vmem:[#allocation20_spill] sm:$0xff] %v4467_v57  ;;  %v1268_v20 = vpop.xlane.xlu1 %1267  ;;  %3285 = vmatprep.mubr.msk.f32.mxu1 %vm303_vm0, %v4467_v57  ;;  %v3434_v53 = vpop.eup %3433 }
 0x1b8   : > { %v1611_v43 = vmax.f32 %v1419_v15, 1e-24  ;;  %1111 = vadd.xlane.f32.xlu0 %v1110_v33  ;;  %3286 = vmatmul.mubr.msk.f32.gmra.mxu1 %vm303_vm0, %v4472_v34  ;;  %v3436_v52 = vpop.eup %3435  ;;  %v1482_v60 = vmax.f32 %v1268_v20, 1e-24  ;;  %v4491_v34 = vadd.f32 %v4332_v5, %v3252_v42  ;;  %v862_v0 = vpop.f32.mrf.mxu0  ;;  %v942_v42 = vmul.f32 %v4484_v1, %v4484_v1 }
 0x1b9   : > { %v1010_v38 = vpop.xlane.xlu0 %1009  ;;  %v3438_v59 = vpop.eup %3437  ;;  %v1735_v57 = vsel %vm883_vm1, %v3436_v52, %v3434_v53 }
 0x1ba   : > { %v1418_v9 = vsub.f32 %v1010_v38, %v1268_v20  ;;  %1378 = vadd.xlane.f32.xlu1 %v1377_v41  ;;  %3449 = vrsqrt.f32 %v1611_v43  ;;  %v1201_v20 = vsel %vm883_vm1, %v943_v31, 0.0  ;;  %v1374_v43 = vsel %vm303_vm0, %v1198_v36, 0.0  ;;  %v3255_v53 = vpop.f32.mrf.mxu0 }
 0x1bb   : > { %v3440_v15 = vpop.eup %3439  ;;  %v1277_v33 = vpop.xlane.xlu1 %1276  ;;  %3451 = vrsqrt.f32 %v1483_v12  ;;  %v4504_v52 = vmul.f32 %v1735_v57, %v3978_v46 }
 0x1bc   : > { %v1610_v28 = vmax.f32 %v1418_v9, 1e-24  ;;  %1120 = vadd.xlane.f32.xlu0 %v1119_v25  ;;  %v1734_v45 = vsel %vm883_vm1, %v3438_v59, %v3440_v15  ;;  %3453 = vrsqrt.f32 %v1482_v60  ;;  %v1116_v60 = vsel %vm303_vm0, %v940_v14, 0.0 }
 0x1bd   : > { %v1019_v41 = vpop.xlane.xlu0 %1018  ;;  %v4499_v38 = vmul.f32 %v1734_v45, %v3989_v56  ;;  %5321 = vst [vmem:[#allocation23_spill] sm:$0xff] %v4504_v52  ;;  %v1383_v59 = vsel %vm303_vm0, %v1201_v20, 0.0  ;;  %v945_v56 = vmul.f32 %v4491_v34, %v4491_v34  ;;  %v1485_v36 = vmax.f32 %v1277_v33, 1e-24 }
 0x1be   : > { %3455 = vrsqrt.f32 %v1610_v28  ;;  %v1421_v12 = vsub.f32 %v1019_v41, %v1277_v33  ;;  %1375 = vadd.xlane.f32.xlu1 %v1374_v43  ;;  %v1125_v45 = vsel %vm303_vm0, %v943_v31, 0.0  ;;  %v872_v41 = vpop.f32.mrf.mxu0  ;;  %v4516_v20 = vadd.f32 %v4332_v5, %v862_v0 }
 0x1bf   : > { %5320 = vst [vmem:[#allocation22_spill] sm:$0xff] %v4499_v38  ;;  %v1274_v25 = vpop.xlane.xlu1 %1273  ;;  %3288 = vmatprep.mubr.msk.f32.mxu1 %vm303_vm0, %v4499_v38  ;;  %v3442_v9 = vpop.eup %3441  ;;  %v1200_v33 = vsel %vm883_vm1, %v942_v42, 0.0  ;;  %v4527_v0 = vadd.f32 %v4332_v5, %v872_v41 }
 0x1c0   : > { %v1613_v15 = vmax.f32 %v1421_v12, 1e-24  ;;  %1117 = vadd.xlane.f32.xlu0 %v1116_v60  ;;  %3289 = vmatmul.mubr.msk.f32.gmra.mxu1 %vm303_vm0, %v4504_v52  ;;  %v3444_v46 = vpop.eup %3443  ;;  %v1484_v57 = vmax.f32 %v1274_v25, 1e-24  ;;  %v1203_v52 = vsel %vm883_vm1, %v945_v56, 0.0 }
 0x1c1   : > { %v1016_v28 = vpop.xlane.xlu0 %1015  ;;  %v3446_v43 = vpop.eup %3445  ;;  %v1737_v38 = vsel %vm883_vm1, %v3444_v46, %v3442_v9  ;;  %v944_v9 = vmul.f32 %v4516_v20, %v4516_v20  ;;  %v1389_v41 = vsel %vm303_vm0, %v1203_v52, 0.0 }
 0x1c2   : > { %v1420_v14 = vsub.f32 %v1016_v28, %v1274_v25  ;;  %1384 = vadd.xlane.f32.xlu1 %v1383_v59  ;;  %3457 = vrsqrt.f32 %v1613_v15  ;;  %v1380_v15 = vsel %vm303_vm0, %v1200_v33, 0.0  ;;  %v4536_v46 = vmul.f32 %v1737_v38, %v3996_v61 }
 0x1c3   : > { %v3448_v12 = vpop.eup %3447  ;;  %v1283_v60 = vpop.xlane.xlu1 %1282  ;;  %3459 = vrsqrt.f32 %v1485_v36  ;;  %v946_v33 = vmul.f32 %v4527_v0, %v4527_v0 }
 0x1c4   : > { %v1612_v31 = vmax.f32 %v1420_v14, 1e-24  ;;  %1126 = vadd.xlane.f32.xlu0 %v1125_v45  ;;  %v1736_v25 = vsel %vm883_vm1, %v3446_v43, %v3448_v12  ;;  %3461 = vrsqrt.f32 %v1484_v57  ;;  %v1122_v57 = vsel %vm303_vm0, %v942_v42, 0.0 }
 0x1c5   : > { %v1025_v59 = vpop.xlane.xlu0 %1024  ;;  %v4531_v28 = vmul.f32 %v1736_v25, %v4007_v11  ;;  %v1487_v11 = vmax.f32 %v1283_v60, 1e-24  ;;  %v4548_v42 = vadd.f32 %v4332_v5, %v3255_v53  ;;  %v1204_v5 = vsel %vm883_vm1, %v946_v33, 0.0 }
 0x1c6   : > { %3463 = vrsqrt.f32 %v1612_v31  ;;  %v1423_v36 = vsub.f32 %v1025_v59, %v1283_v60  ;;  %1381 = vadd.xlane.f32.xlu1 %v1380_v15  ;;  %v1131_v31 = vsel %vm303_vm0, %v945_v56, 0.0  ;;  %v1202_v60 = vsel %vm883_vm1, %v944_v9, 0.0 }
 0x1c7   : > { %v1280_v45 = vpop.xlane.xlu1 %1279  ;;  %3291 = vmatprep.mubr.msk.f32.mxu1 %vm303_vm0, %v4531_v28  ;;  %v3450_v43 = vpop.eup %3449 }
 0x1c8   : > { %v1615_v14 = vmax.f32 %v1423_v36, 1e-24  ;;  %1123 = vadd.xlane.f32.xlu0 %v1122_v57  ;;  %3292 = vmatmul.mubr.msk.f32.gmra.mxu1 %vm303_vm0, %v4536_v46  ;;  %v3452_v61 = vpop.eup %3451  ;;  %v1486_v38 = vmax.f32 %v1280_v45, 1e-24 }
 0x1c9   : > { %v1022_v12 = vpop.xlane.xlu0 %1021  ;;  %v3454_v25 = vpop.eup %3453  ;;  %v1739_v36 = vsel %vm883_vm1, %v3452_v61, %v3450_v43 }
 0x1ca   : > { %v1422_v52 = vsub.f32 %v1022_v12, %v1280_v45  ;;  %1390 = vadd.xlane.f32.xlu1 %v1389_v41  ;;  %3465 = vrsqrt.f32 %v1615_v14  ;;  %v1386_v45 = vsel %vm303_vm0, %v1202_v60, 0.0  ;;  %v947_v14 = vmul.f32 %v4548_v42, %v4548_v42 }
 0x1cb   : > { %v3456_v59 = vpop.eup %3455  ;;  %v1289_v15 = vpop.xlane.xlu1 %1288  ;;  %3467 = vrsqrt.f32 %v1487_v11  ;;  %v4565_v11 = vmul.f32 %v1739_v36, %v4014_v16  ;;  %v1392_v12 = vsel %vm303_vm0, %v1204_v5, 0.0  ;;  %v1134_v5 = vsel %vm303_vm0, %v946_v33, 0.0 }
 0x1cc   : > { %v1614_v57 = vmax.f32 %v1422_v52, 1e-24  ;;  %1132 = vadd.xlane.f32.xlu0 %v1131_v31  ;;  %v1738_v56 = vsel %vm883_vm1, %v3454_v25, %v3456_v59  ;;  %3469 = vrsqrt.f32 %v1486_v38  ;;  %v1128_v38 = vsel %vm303_vm0, %v944_v9, 0.0 }
 0x1cd   : > { %v1031_v53 = vpop.xlane.xlu0 %1030  ;;  %v4560_v41 = vmul.f32 %v1738_v56, %v4025_v27  ;;  %v1489_v27 = vmax.f32 %v1289_v15, 1e-24 }
 0x1ce   : > { %3471 = vrsqrt.f32 %v1614_v57  ;;  %v1425_v43 = vsub.f32 %v1031_v53, %v1289_v15  ;;  %1387 = vadd.xlane.f32.xlu1 %v1386_v45  ;;  %v1205_v57 = vsel %vm883_vm1, %v947_v14, 0.0 }
 0x1cf   : > { %v1286_v61 = vpop.xlane.xlu1 %1285  ;;  %3294 = vmatprep.mubr.msk.f32.mxu1 %vm303_vm0, %v4560_v41  ;;  %v3458_v31 = vpop.eup %3457 }
 0x1d0   : > { %v1617_v25 = vmax.f32 %v1425_v43, 1e-24  ;;  %1129 = vadd.xlane.f32.xlu0 %v1128_v38  ;;  %3295 = vmatmul.mubr.msk.f32.gmra.mxu1 %vm303_vm0, %v4565_v11  ;;  %v3460_v52 = vpop.eup %3459  ;;  %v1488_v60 = vmax.f32 %v1286_v61, 1e-24 }
 0x1d1   : > { %v1028_v59 = vpop.xlane.xlu0 %1027  ;;  %v3462_v16 = vpop.eup %3461  ;;  %v1741_v15 = vsel %vm883_vm1, %v3460_v52, %v3458_v31 }
 0x1d2   : > { %v1424_v36 = vsub.f32 %v1028_v59, %v1286_v61  ;;  %1393 = vadd.xlane.f32.xlu1 %v1392_v12  ;;  %3473 = vrsqrt.f32 %v1617_v25  ;;  %v1395_v61 = vsel %vm303_vm0, %v1205_v57, 0.0  ;;  %v4585_v33 = vmul.f32 %v1741_v15, %v4032_v32 }
 0x1d3   : > { %v3464_v56 = vpop.eup %3463  ;;  %v1295_v9 = vpop.xlane.xlu1 %1294  ;;  %3475 = vrsqrt.f32 %v1489_v27  ;;  %v1137_v27 = vsel %vm303_vm0, %v947_v14, 0.0 }
 0x1d4   : > { %v1616_v53 = vmax.f32 %v1424_v36, 1e-24  ;;  %1135 = vadd.xlane.f32.xlu0 %v1134_v5  ;;  %v1740_v45 = vsel %vm883_vm1, %v3462_v16, %v3464_v56  ;;  %3477 = vrsqrt.f32 %v1488_v60  ;;  %v1491_v52 = vmax.f32 %v1295_v9, 1e-24 }
 0x1d5   : > { %v1037_v43 = vpop.xlane.xlu0 %1036  ;;  %v4582_v38 = vmul.f32 %v1740_v45, %v4043_v44 }
 0x1d6   : > { %3479 = vrsqrt.f32 %v1616_v53  ;;  %v1427_v12 = vsub.f32 %v1037_v43, %v1295_v9  ;;  %1396 = vadd.xlane.f32.xlu1 %v1395_v61 }
 0x1d7   : > { %v1292_v31 = vpop.xlane.xlu1 %1291  ;;  %3297 = vmatprep.mubr.msk.f32.mxu1 %vm303_vm0, %v4582_v38  ;;  %v3466_v25 = vpop.eup %3465 }
 0x1d8   : > { %v1619_v60 = vmax.f32 %v1427_v12, 1e-24  ;;  %1138 = vadd.xlane.f32.xlu0 %v1137_v27  ;;  %3298 = vmatmul.mubr.msk.f32.gmra.mxu1 %vm303_vm0, %v4585_v33  ;;  %v3468_v44 = vpop.eup %3467  ;;  %v1490_v59 = vmax.f32 %v1292_v31, 1e-24 }
 0x1d9   : > { %v1034_v16 = vpop.xlane.xlu0 %1033  ;;  %v3470_v36 = vpop.eup %3469  ;;  %v1743_v5 = vsel %vm883_vm1, %v3468_v44, %v3466_v25 }
 0x1da   : > { %v1426_v57 = vsub.f32 %v1034_v16, %v1292_v31  ;;  %3481 = vrsqrt.f32 %v1619_v60  ;;  %v4600_v43 = vmul.f32 %v1743_v5, %v4050_v50 }
 0x1db   : > { %v3472_v32 = vpop.eup %3471  ;;  %v1301_v56 = vpop.xlane.xlu1 %1300  ;;  %3483 = vrsqrt.f32 %v1491_v52 }
 0x1dc   : > { %v1618_v14 = vmax.f32 %v1426_v57, 1e-24  ;;  %v1742_v9 = vsel %vm883_vm1, %v3470_v36, %v3472_v32  ;;  %3485 = vrsqrt.f32 %v1490_v59  ;;  %v1493_v31 = vmax.f32 %v1301_v56, 1e-24 }
 0x1dd   : > { %v1043_v15 = vpop.xlane.xlu0 %1042  ;;  %v4597_v53 = vmul.f32 %v1742_v9, %v4061_v63 }
 0x1de   : > { %3487 = vrsqrt.f32 %v1618_v14  ;;  %v1429_v45 = vsub.f32 %v1043_v15, %v1301_v56 }
 0x1df   : > { %v1298_v61 = vpop.xlane.xlu1 %1297  ;;  %3300 = vmatprep.mubr.msk.f32.mxu1 %vm303_vm0, %v4597_v53  ;;  %v3474_v12 = vpop.eup %3473 }
 0x1e0   : > { %v1621_v27 = vmax.f32 %v1429_v45, 1e-24  ;;  %3301 = vmatmul.mubr.msk.f32.gmra.mxu1 %vm303_vm0, %v4600_v43  ;;  %v3476_v25 = vpop.eup %3475  ;;  %v1492_v52 = vmax.f32 %v1298_v61, 1e-24 }
 0x1e1   : > { %v1040_v60 = vpop.xlane.xlu0 %1039  ;;  %v3478_v63 = vpop.eup %3477  ;;  %v1745_v50 = vsel %vm883_vm1, %v3476_v25, %v3474_v12 }
 0x1e2   : > { %v1428_v44 = vsub.f32 %v1040_v60, %v1298_v61  ;;  %3489 = vrsqrt.f32 %v1621_v27  ;;  %v4614_v14 = vmul.f32 %v1745_v50, %v4068_v2 }
 0x1e3   : > { %v3480_v59 = vpop.eup %3479  ;;  %v1307_v16 = vpop.xlane.xlu1 %1306  ;;  %3491 = vrsqrt.f32 %v1493_v31 }
 0x1e4   : > { %v1620_v36 = vmax.f32 %v1428_v44, 1e-24  ;;  %v1744_v57 = vsel %vm883_vm1, %v3478_v63, %v3480_v59  ;;  %3493 = vrsqrt.f32 %v1492_v52  ;;  %v1495_v45 = vmax.f32 %v1307_v16, 1e-24 }
 0x1e5   : > { %v1049_v32 = vpop.xlane.xlu0 %1048  ;;  %v4611_v56 = vmul.f32 %v1744_v57, %v4079_v21 }
 0x1e6   : > { %3495 = vrsqrt.f32 %v1620_v36  ;;  %v1431_v5 = vsub.f32 %v1049_v32, %v1307_v16 }
 0x1e7   : > { %v1304_v9 = vpop.xlane.xlu1 %1303  ;;  %3303 = vmatprep.mubr.msk.f32.mxu1 %vm303_vm0, %v4611_v56  ;;  %v3482_v15 = vpop.eup %3481 }
 0x1e8   : > { %v1623_v61 = vmax.f32 %v1431_v5, 1e-24  ;;  %3304 = vmatmul.mubr.msk.f32.gmra.mxu1 %vm303_vm0, %v4614_v14  ;;  %v3484_v12 = vpop.eup %3483  ;;  %v1494_v31 = vmax.f32 %v1304_v9, 1e-24 }
 0x1e9   : > { %v1046_v27 = vpop.xlane.xlu0 %1045  ;;  %v3486_v21 = vpop.eup %3485  ;;  %v1747_v2 = vsel %vm883_vm1, %v3484_v12, %v3482_v15 }
 0x1ea   : > { %v1430_v25 = vsub.f32 %v1046_v27, %v1304_v9  ;;  %3497 = vrsqrt.f32 %v1623_v61  ;;  %v4628_v36 = vmul.f32 %v1747_v2, %v4086_v24 }
 0x1eb   : > { %v3488_v52 = vpop.eup %3487  ;;  %v1313_v60 = vpop.xlane.xlu1 %1312  ;;  %3499 = vrsqrt.f32 %v1495_v45 }
 0x1ec   : > { %v1622_v63 = vmax.f32 %v1430_v25, 1e-24  ;;  %v1746_v44 = vsel %vm883_vm1, %v3486_v21, %v3488_v52  ;;  %3501 = vrsqrt.f32 %v1494_v31  ;;  %v1497_v5 = vmax.f32 %v1313_v60, 1e-24 }
 0x1ed   : > { %v1055_v59 = vpop.xlane.xlu0 %1054  ;;  %v4625_v16 = vmul.f32 %v1746_v44, %v4097_v40 }
 0x1ee   : > { %3503 = vrsqrt.f32 %v1622_v63  ;;  %v1433_v50 = vsub.f32 %v1055_v59, %v1313_v60 }
 0x1ef   : > { %v1310_v57 = vpop.xlane.xlu1 %1309  ;;  %3306 = vmatprep.mubr.msk.f32.mxu1 %vm303_vm0, %v4625_v16  ;;  %v3490_v32 = vpop.eup %3489 }
 0x1f0   : > { %v1625_v9 = vmax.f32 %v1433_v50, 1e-24  ;;  %3307 = vmatmul.mubr.msk.f32.gmra.mxu1 %vm303_vm0, %v4628_v36  ;;  %v3492_v15 = vpop.eup %3491  ;;  %v1496_v45 = vmax.f32 %v1310_v57, 1e-24 }
 0x1f1   : > { %v1052_v61 = vpop.xlane.xlu0 %1051  ;;  %v3494_v40 = vpop.eup %3493  ;;  %v1749_v24 = vsel %vm883_vm1, %v3492_v15, %v3490_v32 }
 0x1f2   : > { %v1432_v12 = vsub.f32 %v1052_v61, %v1310_v57  ;;  %3505 = vrsqrt.f32 %v1625_v9  ;;  %v4642_v63 = vmul.f32 %v1749_v24, %v4104_v47 }
 0x1f3   : > { %v3496_v31 = vpop.eup %3495  ;;  %v1319_v27 = vpop.xlane.xlu1 %1318  ;;  %3507 = vrsqrt.f32 %v1497_v5 }
 0x1f4   : > { %v1624_v21 = vmax.f32 %v1432_v12, 1e-24  ;;  %v1748_v25 = vsel %vm883_vm1, %v3494_v40, %v3496_v31  ;;  %3509 = vrsqrt.f32 %v1496_v45  ;;  %v1499_v50 = vmax.f32 %v1319_v27, 1e-24 }
 0x1f5   : > { %v1061_v52 = vpop.xlane.xlu0 %1060  ;;  %v4639_v60 = vmul.f32 %v1748_v25, %v4115_v62 }
 0x1f6   : > { %3511 = vrsqrt.f32 %v1624_v21  ;;  %v1435_v2 = vsub.f32 %v1061_v52, %v1319_v27 }
 0x1f7   : > { %v1316_v44 = vpop.xlane.xlu1 %1315  ;;  %3309 = vmatprep.mubr.msk.f32.mxu1 %vm303_vm0, %v4639_v60  ;;  %v3498_v59 = vpop.eup %3497 }
 0x1f8   : > { %v1627_v57 = vmax.f32 %v1435_v2, 1e-24  ;;  %3310 = vmatmul.mubr.msk.f32.gmra.mxu1 %vm303_vm0, %v4642_v63  ;;  %v3500_v32 = vpop.eup %3499  ;;  %v1498_v5 = vmax.f32 %v1316_v44, 1e-24 }
 0x1f9   : > { %v1058_v9 = vpop.xlane.xlu0 %1057  ;;  %v3502_v62 = vpop.eup %3501  ;;  %v1751_v47 = vsel %vm883_vm1, %v3500_v32, %v3498_v59 }
 0x1fa   : > { %v1434_v15 = vsub.f32 %v1058_v9, %v1316_v44  ;;  %3513 = vrsqrt.f32 %v1627_v57  ;;  %v4656_v21 = vmul.f32 %v1751_v47, %v4122_v3 }
 0x1fb   : > { %v3504_v45 = vpop.eup %3503  ;;  %v1325_v61 = vpop.xlane.xlu1 %1324  ;;  %3515 = vrsqrt.f32 %v1499_v50 }
 0x1fc   : > { %v1626_v40 = vmax.f32 %v1434_v15, 1e-24  ;;  %v1750_v12 = vsel %vm883_vm1, %v3502_v62, %v3504_v45  ;;  %3517 = vrsqrt.f32 %v1498_v5  ;;  %v1501_v2 = vmax.f32 %v1325_v61, 1e-24 }
 0x1fd   : > { %v1067_v31 = vpop.xlane.xlu0 %1066  ;;  %v4653_v27 = vmul.f32 %v1750_v12, %v4133_v23 }
 0x1fe   : > { %3519 = vrsqrt.f32 %v1626_v40  ;;  %v1437_v24 = vsub.f32 %v1067_v31, %v1325_v61 }
 0x1ff   : > { %v1322_v25 = vpop.xlane.xlu1 %1321  ;;  %3312 = vmatprep.mubr.msk.f32.mxu1 %vm303_vm0, %v4653_v27  ;;  %v3506_v52 = vpop.eup %3505 }
 0x200   : > { %v1629_v44 = vmax.f32 %v1437_v24, 1e-24  ;;  %3313 = vmatmul.mubr.msk.f32.gmra.mxu1 %vm303_vm0, %v4656_v21  ;;  %v3508_v59 = vpop.eup %3507  ;;  %v1500_v50 = vmax.f32 %v1322_v25, 1e-24 }
 0x201   : > { %v1064_v57 = vpop.xlane.xlu0 %1063  ;;  %v3510_v23 = vpop.eup %3509  ;;  %v1753_v3 = vsel %vm883_vm1, %v3508_v59, %v3506_v52 }
 0x202   : > { %v1436_v32 = vsub.f32 %v1064_v57, %v1322_v25  ;;  %3521 = vrsqrt.f32 %v1629_v44  ;;  %v4670_v40 = vmul.f32 %v1753_v3, %v4140_v30 }
 0x203   : > { %v3512_v5 = vpop.eup %3511  ;;  %v1331_v9 = vpop.xlane.xlu1 %1330  ;;  %3523 = vrsqrt.f32 %v1501_v2 }
 0x204   : > { %v1628_v62 = vmax.f32 %v1436_v32, 1e-24  ;;  %v1752_v15 = vsel %vm883_vm1, %v3510_v23, %v3512_v5  ;;  %3525 = vrsqrt.f32 %v1500_v50  ;;  %v1503_v24 = vmax.f32 %v1331_v9, 1e-24 }
 0x205   : > { %v1073_v45 = vpop.xlane.xlu0 %1072  ;;  %v4667_v61 = vmul.f32 %v1752_v15, %v4151_v51 }
 0x206   : > { %3527 = vrsqrt.f32 %v1628_v62  ;;  %v1439_v47 = vsub.f32 %v1073_v45, %v1331_v9 }
 0x207   : > { %v1328_v12 = vpop.xlane.xlu1 %1327  ;;  %3315 = vmatprep.mubr.msk.f32.mxu1 %vm303_vm0, %v4667_v61  ;;  %v3514_v31 = vpop.eup %3513 }
 0x208   : > { %v1631_v25 = vmax.f32 %v1439_v47, 1e-24  ;;  %3316 = vmatmul.mubr.msk.f32.gmra.mxu1 %vm303_vm0, %v4670_v40  ;;  %v3516_v52 = vpop.eup %3515  ;;  %v1502_v2 = vmax.f32 %v1328_v12, 1e-24 }
 0x209   : > { %v1070_v44 = vpop.xlane.xlu0 %1069  ;;  %v3518_v51 = vpop.eup %3517  ;;  %v1755_v30 = vsel %vm883_vm1, %v3516_v52, %v3514_v31 }
 0x20a   : > { %v1438_v59 = vsub.f32 %v1070_v44, %v1328_v12  ;;  %3529 = vrsqrt.f32 %v1631_v25  ;;  %v4684_v62 = vmul.f32 %v1755_v30, %v4158_v54 }
 0x20b   : > { %v3520_v50 = vpop.eup %3519  ;;  %v1337_v57 = vpop.xlane.xlu1 %1336  ;;  %3531 = vrsqrt.f32 %v1503_v24 }
 0x20c   : > { %v1630_v23 = vmax.f32 %v1438_v59, 1e-24  ;;  %v1754_v32 = vsel %vm883_vm1, %v3518_v51, %v3520_v50  ;;  %3533 = vrsqrt.f32 %v1502_v2  ;;  %v1505_v47 = vmax.f32 %v1337_v57, 1e-24 }
 0x20d   : > { %v1079_v5 = vpop.xlane.xlu0 %1078  ;;  %v4681_v9 = vmul.f32 %v1754_v32, %v4169_v13 }
 0x20e   : > { %3535 = vrsqrt.f32 %v1630_v23  ;;  %v1441_v3 = vsub.f32 %v1079_v5, %v1337_v57 }
 0x20f   : > { %v1334_v15 = vpop.xlane.xlu1 %1333  ;;  %3318 = vmatprep.mubr.msk.f32.mxu1 %vm303_vm0, %v4681_v9  ;;  %v3522_v45 = vpop.eup %3521 }
 0x210   : > { %v1633_v12 = vmax.f32 %v1441_v3, 1e-24  ;;  %3319 = vmatmul.mubr.msk.f32.gmra.mxu1 %vm303_vm0, %v4684_v62  ;;  %v3524_v31 = vpop.eup %3523  ;;  %v1504_v24 = vmax.f32 %v1334_v15, 1e-24 }
 0x211   : > { %v1076_v25 = vpop.xlane.xlu0 %1075  ;;  %v3526_v13 = vpop.eup %3525  ;;  %v1757_v54 = vsel %vm883_vm1, %v3524_v31, %v3522_v45 }
 0x212   : > { %v1440_v52 = vsub.f32 %v1076_v25, %v1334_v15  ;;  %3537 = vrsqrt.f32 %v1633_v12  ;;  %v4698_v23 = vmul.f32 %v1757_v54, %v4176_v22 }
 0x213   : > { %v3528_v2 = vpop.eup %3527  ;;  %v1343_v44 = vpop.xlane.xlu1 %1342  ;;  %3539 = vrsqrt.f32 %v1505_v47 }
 0x214   : > { %v1632_v51 = vmax.f32 %v1440_v52, 1e-24  ;;  %v1756_v59 = vsel %vm883_vm1, %v3526_v13, %v3528_v2  ;;  %3541 = vrsqrt.f32 %v1504_v24  ;;  %v1507_v3 = vmax.f32 %v1343_v44, 1e-24 }
 0x215   : > { %v1085_v50 = vpop.xlane.xlu0 %1084  ;;  %v4695_v57 = vmul.f32 %v1756_v59, %v4187_v55  ;;  %v5323_v59 = vld [vmem:[#allocation2_spill] sm:$0xff] }
 0x216   : > { %3543 = vrsqrt.f32 %v1632_v51  ;;  %v1443_v30 = vsub.f32 %v1085_v50, %v1343_v44  ;;  %v5322_v44 = vld [vmem:[#allocation3_spill] sm:$0xff] }
 0x217   : > { %v1340_v32 = vpop.xlane.xlu1 %1339  ;;  %3321 = vmatprep.mubr.msk.f32.mxu1 %vm303_vm0, %v4695_v57  ;;  %v3530_v5 = vpop.eup %3529 }
 0x218   : > { %v1635_v15 = vmax.f32 %v1443_v30, 1e-24  ;;  %3322 = vmatmul.mubr.msk.f32.gmra.mxu1 %vm303_vm0, %v4698_v23  ;;  %v3532_v45 = vpop.eup %3531  ;;  %v1506_v47 = vmax.f32 %v1340_v32, 1e-24 }
 0x219   : > { %v1082_v12 = vpop.xlane.xlu0 %1081  ;;  %v3534_v55 = vpop.eup %3533  ;;  %v1759_v22 = vsel %vm883_vm1, %v3532_v45, %v3530_v5 }
 0x21a   : > { %v1442_v31 = vsub.f32 %v1082_v12, %v1340_v32  ;;  %3545 = vrsqrt.f32 %v1635_v15  ;;  %v4712_v50 = vmul.f32 %v1759_v22, %v5323_v59 }
 0x21b   : > { %v3536_v24 = vpop.eup %3535  ;;  %v1349_v25 = vpop.xlane.xlu1 %1348  ;;  %3547 = vrsqrt.f32 %v1507_v3 }
 0x21c   : > { %v1634_v13 = vmax.f32 %v1442_v31, 1e-24  ;;  %v1758_v52 = vsel %vm883_vm1, %v3534_v55, %v3536_v24  ;;  %3549 = vrsqrt.f32 %v1506_v47  ;;  %v1509_v5 = vmax.f32 %v1349_v25, 1e-24 }
 0x21d   : > { %v1091_v2 = vpop.xlane.xlu0 %1090  ;;  %v4709_v54 = vmul.f32 %v1758_v52, %v5322_v44 }
 0x21e   : > { %3551 = vrsqrt.f32 %v1634_v13  ;;  %v1445_v51 = vsub.f32 %v1091_v2, %v1349_v25 }
 0x21f   : > { %v1346_v30 = vpop.xlane.xlu1 %1345  ;;  %3324 = vmatprep.mubr.msk.f32.mxu1 %vm303_vm0, %v4709_v54  ;;  %v3538_v32 = vpop.eup %3537 }
 0x220   : > { %v1637_v3 = vmax.f32 %v1445_v51, 1e-24  ;;  %3325 = vmatmul.mubr.msk.f32.gmra.mxu1 %vm303_vm0, %v4712_v50  ;;  %v3540_v15 = vpop.eup %3539  ;;  %v1508_v45 = vmax.f32 %v1346_v30, 1e-24  ;;  %v5324_v51 = vld [vmem:[#allocation4_spill] sm:$0xff] }
 0x221   : > { %v1088_v47 = vpop.xlane.xlu0 %1087  ;;  %v3542_v12 = vpop.eup %3541  ;;  %v1761_v22 = vsel %vm883_vm1, %v3540_v15, %v3538_v32 }
 0x222   : > { %v1444_v55 = vsub.f32 %v1088_v47, %v1346_v30  ;;  %3553 = vrsqrt.f32 %v1637_v3  ;;  %v4726_v59 = vmul.f32 %v1761_v22, %v5324_v51 }
 0x223   : > { %v3544_v31 = vpop.eup %3543  ;;  %v1355_v24 = vpop.xlane.xlu1 %1354  ;;  %3555 = vrsqrt.f32 %v1509_v5 }
 0x224   : > { %v1636_v13 = vmax.f32 %v1444_v55, 1e-24  ;;  %v1760_v25 = vsel %vm883_vm1, %v3542_v12, %v3544_v31  ;;  %3557 = vrsqrt.f32 %v1508_v45  ;;  %v1511_v5 = vmax.f32 %v1355_v24, 1e-24 }
 0x225   : > { %v1097_v52 = vpop.xlane.xlu0 %1096  ;;  %v4723_v2 = vmul.f32 %v1760_v25, %v4223_v29 }
 0x226   : > { %3559 = vrsqrt.f32 %v1636_v13  ;;  %v1447_v44 = vsub.f32 %v1097_v52, %v1355_v24 }
 0x227   : > { %v1352_v30 = vpop.xlane.xlu1 %1351  ;;  %3327 = vmatprep.mubr.msk.f32.mxu1 %vm303_vm0, %v4723_v2  ;;  %v3546_v32 = vpop.eup %3545 }
 0x228   : > { %v1639_v3 = vmax.f32 %v1447_v44, 1e-24  ;;  %3328 = vmatmul.mubr.msk.f32.gmra.mxu1 %vm303_vm0, %v4726_v59  ;;  %v3548_v15 = vpop.eup %3547  ;;  %v1510_v45 = vmax.f32 %v1352_v30, 1e-24 }
 0x229   : > { %v1094_v47 = vpop.xlane.xlu0 %1093  ;;  %v3550_v29 = vpop.eup %3549  ;;  %v1763_v22 = vsel %vm883_vm1, %v3548_v15, %v3546_v32 }
 0x22a   : > { %v1446_v12 = vsub.f32 %v1094_v47, %v1352_v30  ;;  %3561 = vrsqrt.f32 %v1639_v3  ;;  %v4740_v51 = vmul.f32 %v1763_v22, %v4230_v26 }
 0x22b   : > { %v3552_v55 = vpop.eup %3551  ;;  %v1361_v31 = vpop.xlane.xlu1 %1360  ;;  %3563 = vrsqrt.f32 %v1511_v5 }
 0x22c   : > { %v1638_v13 = vmax.f32 %v1446_v12, 1e-24  ;;  %v1762_v24 = vsel %vm883_vm1, %v3550_v29, %v3552_v55  ;;  %3565 = vrsqrt.f32 %v1510_v45  ;;  %v1513_v5 = vmax.f32 %v1361_v31, 1e-24 }
 0x22d   : > { %v1103_v25 = vpop.xlane.xlu0 %1102  ;;  %v4737_v52 = vmul.f32 %v1762_v24, %v4255_v39 }
 0x22e   : > { %3567 = vrsqrt.f32 %v1638_v13  ;;  %v1449_v44 = vsub.f32 %v1103_v25, %v1361_v31 }
 0x22f   : > { %v1358_v30 = vpop.xlane.xlu1 %1357  ;;  %3330 = vmatprep.mubr.msk.f32.mxu1 %vm303_vm0, %v4737_v52  ;;  %v3554_v32 = vpop.eup %3553 }
 0x230   : > { %v1641_v3 = vmax.f32 %v1449_v44, 1e-24  ;;  %3331 = vmatmul.mubr.msk.f32.gmra.mxu1 %vm303_vm0, %v4740_v51  ;;  %v3556_v15 = vpop.eup %3555  ;;  %v1512_v45 = vmax.f32 %v1358_v30, 1e-24 }
 0x231   : > { %v1100_v47 = vpop.xlane.xlu0 %1099  ;;  %v3558_v39 = vpop.eup %3557  ;;  %v1765_v26 = vsel %vm883_vm1, %v3556_v15, %v3554_v32 }
 0x232   : > { %v1448_v29 = vsub.f32 %v1100_v47, %v1358_v30  ;;  %3569 = vrsqrt.f32 %v1641_v3  ;;  %v4754_v44 = vmul.f32 %v1765_v26, %v4266_v18 }
 0x233   : > { %v3560_v12 = vpop.eup %3559  ;;  %v1367_v55 = vpop.xlane.xlu1 %1366  ;;  %3571 = vrsqrt.f32 %v1513_v5 }
 0x234   : > { %v1640_v22 = vmax.f32 %v1448_v29, 1e-24  ;;  %v1764_v31 = vsel %vm883_vm1, %v3558_v39, %v3560_v12  ;;  %3573 = vrsqrt.f32 %v1512_v45  ;;  %v1515_v5 = vmax.f32 %v1367_v55, 1e-24 }
 0x235   : > { %v1109_v13 = vpop.xlane.xlu0 %1108  ;;  %v4751_v24 = vmul.f32 %v1764_v31, %v4287_v17 }
 0x236   : > { %3575 = vrsqrt.f32 %v1640_v22  ;;  %v1451_v25 = vsub.f32 %v1109_v13, %v1367_v55 }
 0x237   : > { %v1364_v30 = vpop.xlane.xlu1 %1363  ;;  %3333 = vmatprep.mubr.msk.f32.mxu1 %vm303_vm0, %v4751_v24  ;;  %v3562_v32 = vpop.eup %3561 }
 0x238   : > { %v1643_v3 = vmax.f32 %v1451_v25, 1e-24  ;;  %3334 = vmatmul.mubr.msk.f32.gmra.mxu1 %vm303_vm0, %v4754_v44  ;;  %v3564_v15 = vpop.eup %3563  ;;  %v1514_v45 = vmax.f32 %v1364_v30, 1e-24  ;;  %v4770_v25 = vld [vmem:[%s5275_s4] ss:$0 sm:$0xff] }
 0x239   : > { %v1106_v47 = vpop.xlane.xlu0 %1105  ;;  %v3566_v17 = vpop.eup %3565  ;;  %v1767_v18 = vsel %vm883_vm1, %v3564_v15, %v3562_v32 }
 0x23a   : > { %v1450_v39 = vsub.f32 %v1106_v47, %v1364_v30  ;;  %3577 = vrsqrt.f32 %v1643_v3  ;;  %v4773_v30 = vmul.f32 %v1767_v18, %v4294_v8 }
 0x23b   : > { %v3568_v29 = vpop.eup %3567  ;;  %v1373_v12 = vpop.xlane.xlu1 %1372  ;;  %3579 = vrsqrt.f32 %v1515_v5 }
 0x23c   : > { %v1642_v26 = vmax.f32 %v1450_v39, 1e-24  ;;  %v1766_v55 = vsel %vm883_vm1, %v3566_v17, %v3568_v29  ;;  %3581 = vrsqrt.f32 %v1514_v45  ;;  %v1517_v3 = vmax.f32 %v1373_v12, 1e-24 }
 0x23d   : > { %v1115_v22 = vpop.xlane.xlu0 %1114  ;;  %v4765_v31 = vmul.f32 %v1766_v55, %v4319_v4 }
 0x23e   : > { %3583 = vrsqrt.f32 %v1642_v26  ;;  %v1453_v13 = vsub.f32 %v1115_v22, %v1373_v12 }
 0x23f   : > { %v1370_v32 = vpop.xlane.xlu1 %1369  ;;  %3336 = vmatprep.mubr.msk.f32.mxu1 %vm303_vm0, %v4765_v31  ;;  %v3570_v5 = vpop.eup %3569 }
 0x240   : > { %v1645_v15 = vmax.f32 %v1453_v13, 1e-24  ;;  %v3266_v45 = vpop.f32.mrf.mxu1  ;;  %3337 = vmatmul.mubr.msk.f32.gmra.mxu1 %vm303_vm0, %v4773_v30  ;;  %v3572_v4 = vpop.eup %3571  ;;  %v1516_v47 = vmax.f32 %v1370_v32, 1e-24 }
 0x241   : > { %v2121_v17 = vadd.f32 %v3266_v45, %v4770_v25  ;;  %v1112_v39 = vpop.xlane.xlu0 %1111  ;;  %v3574_v29 = vpop.eup %3573  ;;  %v1769_v12 = vsel %vm883_vm1, %v3572_v4, %v3570_v5 }
 0x242   : > { %v1452_v26 = vsub.f32 %v1112_v39, %v1370_v32  ;;  %v2115_v8 = vpop.f32.mrf.mxu1  ;;  %3585 = vrsqrt.f32 %v1645_v15 }
 0x243   : > { %v3576_v18 = vpop.eup %3575  ;;  %v2116_v55 = vadd.f32 %v4770_v25, %v2115_v8  ;;  %v1379_v22 = vpop.xlane.xlu1 %1378  ;;  %2500 = vrot.lane.b32.xlu1 %v2121_v17, %s3634_s23  ;;  %3587 = vrsqrt.f32 %v1517_v3  ;;  %v4791_v8 = vmul.f32 %v1769_v12, %v4335_v49 }
 0x244   : > { %v1644_v13 = vmax.f32 %v1452_v26, 1e-24  ;;  %v1768_v45 = vsel %vm883_vm1, %v3574_v29, %v3576_v18  ;;  %3589 = vrsqrt.f32 %v1516_v47  ;;  %v1519_v3 = vmax.f32 %v1379_v22, 1e-24 }
 0x245   : > { %2498 = vrot.lane.b32.xlu0 %v2116_v55, %s3634_s23  ;;  %v1121_v32 = vpop.xlane.xlu0 %1120  ;;  %v4788_v15 = vmul.f32 %v1768_v45, %v4356_v7 }
 0x246   : > { %3591 = vrsqrt.f32 %v1644_v13  ;;  %v1455_v39 = vsub.f32 %v1121_v32, %v1379_v22 }
 0x247   : > { %5325 = vst [vmem:[#allocation3_spill] sm:$0xff] %v4788_v15  ;;  %v1376_v17 = vpop.xlane.xlu1 %1375  ;;  %3339 = vmatprep.mubr.msk.f32.mxu1 %vm303_vm0, %v4788_v15  ;;  %v3578_v5 = vpop.eup %3577 }
 0x248   : > { %v1647_v4 = vmax.f32 %v1455_v39, 1e-24  ;;  %v3269_v29 = vpop.f32.mrf.mxu1  ;;  %3340 = vmatmul.mubr.msk.f32.gmra.mxu1 %vm303_vm0, %v4791_v8  ;;  %v3580_v47 = vpop.eup %3579  ;;  %v1518_v26 = vmax.f32 %v1376_v17, 1e-24 }
 0x249   : > { %v2131_v7 = vadd.f32 %v3269_v29, %v4770_v25  ;;  %v1118_v18 = vpop.xlane.xlu0 %1117  ;;  %v3582_v55 = vpop.eup %3581  ;;  %v1771_v22 = vsel %vm883_vm1, %v3580_v47, %v3578_v5 }
 0x24a   : > { %v1454_v13 = vsub.f32 %v1118_v18, %v1376_v17  ;;  %v2125_v49 = vpop.f32.mrf.mxu1  ;;  %3593 = vrsqrt.f32 %v1647_v4  ;;  %v4808_v18 = vmul.f32 %v1771_v22, %v4363_v10 }
 0x24b   : > { %v3584_v12 = vpop.eup %3583  ;;  %v1385_v45 = vpop.xlane.xlu1 %1384  ;;  %2504 = vrot.lane.b32.xlu1 %v2131_v7, %s3634_s23  ;;  %3595 = vrsqrt.f32 %v1519_v3  ;;  %v2126_v29 = vadd.f32 %v4770_v25, %v2125_v49 }
 0x24c   : > { %v1646_v32 = vmax.f32 %v1454_v13, 1e-24  ;;  %v1770_v39 = vsel %vm883_vm1, %v3582_v55, %v3584_v12  ;;  %3597 = vrsqrt.f32 %v1518_v26  ;;  %v1521_v3 = vmax.f32 %v1385_v45, 1e-24 }
 0x24d   : > { %v1127_v15 = vpop.xlane.xlu0 %1126  ;;  %v4805_v17 = vmul.f32 %v1770_v39, %v4388_v37 }
 0x24e   : > { %3599 = vrsqrt.f32 %v1646_v32  ;;  %v1457_v4 = vsub.f32 %v1127_v15, %v1385_v45 }
 0x24f   : > { %v1382_v7 = vpop.xlane.xlu1 %1381  ;;  %2502 = vrot.lane.b32.xlu1 %v2126_v29, %s3634_s23  ;;  %3342 = vmatprep.mubr.msk.f32.mxu1 %vm303_vm0, %v4805_v17  ;;  %v3586_v5 = vpop.eup %3585 }
 0x250   : > { %v1649_v47 = vmax.f32 %v1457_v4, 1e-24  ;;  %v3272_v26 = vpop.f32.mrf.mxu1  ;;  %3343 = vmatmul.mubr.msk.f32.gmra.mxu1 %vm303_vm0, %v4808_v18  ;;  %v3588_v37 = vpop.eup %3587  ;;  %v1520_v55 = vmax.f32 %v1382_v7, 1e-24 }
 0x251   : > { %v2141_v15 = vadd.f32 %v3272_v26, %v4770_v25  ;;  %v1124_v13 = vpop.xlane.xlu0 %1123  ;;  %v3590_v10 = vpop.eup %3589  ;;  %v1773_v45 = vsel %vm883_vm1, %v3588_v37, %v3586_v5 }
 0x252   : > { %v1456_v49 = vsub.f32 %v1124_v13, %v1382_v7  ;;  %v2135_v12 = vpop.f32.mrf.mxu1  ;;  %3601 = vrsqrt.f32 %v1649_v47  ;;  %v4827_v13 = vmul.f32 %v1773_v45, %v4399_v19 }
 0x253   : > { %v3592_v22 = vpop.eup %3591  ;;  %v2136_v32 = vadd.f32 %v4770_v25, %v2135_v12  ;;  %v1391_v39 = vpop.xlane.xlu1 %1390  ;;  %2508 = vrot.lane.b32.xlu1 %v2141_v15, %s3634_s23  ;;  %3603 = vrsqrt.f32 %v1521_v3 }
 0x254   : > { %v1648_v29 = vmax.f32 %v1456_v49, 1e-24  ;;  %v1772_v4 = vsel %vm883_vm1, %v3590_v10, %v3592_v22  ;;  %3605 = vrsqrt.f32 %v1520_v55  ;;  %v1523_v3 = vmax.f32 %v1391_v39, 1e-24 }
 0x255   : > { %2506 = vrot.lane.b32.xlu0 %v2136_v32, %s3634_s23  ;;  %v1133_v7 = vpop.xlane.xlu0 %1132  ;;  %v4824_v26 = vmul.f32 %v1772_v4, %v4420_v58 }
 0x256   : > { %3607 = vrsqrt.f32 %v1648_v29  ;;  %v1459_v47 = vsub.f32 %v1133_v7, %v1391_v39 }
 0x257   : > { %v1388_v15 = vpop.xlane.xlu1 %1387  ;;  %3345 = vmatprep.mubr.msk.f32.mxu1 %vm303_vm0, %v4824_v26  ;;  %v3594_v5 = vpop.eup %3593 }
 0x258   : > { %v1651_v37 = vmax.f32 %v1459_v47, 1e-24  ;;  %v3275_v10 = vpop.f32.mrf.mxu1  ;;  %3346 = vmatmul.mubr.msk.f32.gmra.mxu1 %vm303_vm0, %v4827_v13  ;;  %v3596_v55 = vpop.eup %3595  ;;  %v1522_v49 = vmax.f32 %v1388_v15, 1e-24 }
 0x259   : > { %v2151_v58 = vadd.f32 %v3275_v10, %v4770_v25  ;;  %v1130_v12 = vpop.xlane.xlu0 %1129  ;;  %v3598_v22 = vpop.eup %3597  ;;  %v1775_v39 = vsel %vm883_vm1, %v3596_v55, %v3594_v5 }
 0x25a   : > { %v1458_v32 = vsub.f32 %v1130_v12, %v1388_v15  ;;  %v2145_v19 = vpop.f32.mrf.mxu1  ;;  %3609 = vrsqrt.f32 %v1651_v37 }
 0x25b   : > { %v3600_v45 = vpop.eup %3599  ;;  %v2146_v29 = vadd.f32 %v4770_v25, %v2145_v19  ;;  %v1394_v4 = vpop.xlane.xlu1 %1393  ;;  %2512 = vrot.lane.b32.xlu1 %v2151_v58, %s3634_s23  ;;  %3611 = vrsqrt.f32 %v1523_v3  ;;  %v4845_v58 = vmul.f32 %v1775_v39, %v4427_v48 }
 0x25c   : > { %v1650_v7 = vmax.f32 %v1458_v32, 1e-24  ;;  %v1774_v47 = vsel %vm883_vm1, %v3598_v22, %v3600_v45  ;;  %3613 = vrsqrt.f32 %v1522_v49  ;;  %v1524_v10 = vmax.f32 %v1394_v4, 1e-24 }
 0x25d   : > { %2510 = vrot.lane.b32.xlu0 %v2146_v29, %s3634_s23  ;;  %v1136_v15 = vpop.xlane.xlu0 %1135  ;;  %v4842_v37 = vmul.f32 %v1774_v47, %v4452_v35 }
 0x25e   : > { %3615 = vrsqrt.f32 %v1650_v7  ;;  %v1460_v12 = vsub.f32 %v1136_v15, %v1394_v4 }
 0x25f   : > { %v1397_v19 = vpop.xlane.xlu1 %1396  ;;  %3348 = vmatprep.mubr.msk.f32.mxu1 %vm303_vm0, %v4842_v37  ;;  %v3602_v5 = vpop.eup %3601  ;;  %3617 = vrsqrt.f32 %v1524_v10 }
 0x260   : > { %v1652_v3 = vmax.f32 %v1460_v12, 1e-24  ;;  %v3278_v55 = vpop.f32.mrf.mxu1  ;;  %3349 = vmatmul.mubr.msk.f32.gmra.mxu1 %vm303_vm0, %v4845_v58  ;;  %v3604_v49 = vpop.eup %3603  ;;  %v1525_v22 = vmax.f32 %v1397_v19, 1e-24  ;;  %v5326_v12 = vld [vmem:[#allocation19_spill] sm:$0xff] }
 0x261   : > { %v2161_v35 = vadd.f32 %v3278_v55, %v4770_v25  ;;  %v1139_v32 = vpop.xlane.xlu0 %1138  ;;  %v3606_v45 = vpop.eup %3605  ;;  %v1777_v7 = vsel %vm883_vm1, %v3604_v49, %v3602_v5 }
 0x262   : > { %3619 = vrsqrt.f32 %v1652_v3  ;;  %v1461_v48 = vsub.f32 %v1139_v32, %v1397_v19  ;;  %v2155_v29 = vpop.f32.mrf.mxu1  ;;  %v4863_v19 = vmul.f32 %v1777_v7, %v5326_v12 }
 0x263   : > { %v3608_v4 = vpop.eup %3607  ;;  %v2156_v39 = vadd.f32 %v4770_v25, %v2155_v29  ;;  %2516 = vrot.lane.b32.xlu1 %v2161_v35, %s3634_s23  ;;  %3621 = vrsqrt.f32 %v1525_v22 }
 0x264   : > { %v1653_v47 = vmax.f32 %v1461_v48, 1e-24  ;;  %v1776_v10 = vsel %vm883_vm1, %v3606_v45, %v3608_v4 }
 0x265   : > { %2514 = vrot.lane.b32.xlu0 %v2156_v39, %s3634_s23  ;;  %v4860_v15 = vmul.f32 %v1776_v10, %v4484_v1 }
 0x266   : > { %3623 = vrsqrt.f32 %v1653_v47 }
 0x267   : > { %3351 = vmatprep.mubr.msk.f32.mxu1 %vm303_vm0, %v4860_v15  ;;  %v3610_v3 = vpop.eup %3609 }
 0x268   : > { %v3281_v55 = vpop.f32.mrf.mxu1  ;;  %3352 = vmatmul.mubr.msk.f32.gmra.mxu1 %vm303_vm0, %v4863_v19  ;;  %v3612_v5 = vpop.eup %3611 }
 0x269   : > { %v2171_v49 = vadd.f32 %v3281_v55, %v4770_v25  ;;  %v3614_v22 = vpop.eup %3613  ;;  %v1779_v45 = vsel %vm883_vm1, %v3612_v5, %v3610_v3 }
 0x26a   : > { %v2165_v35 = vpop.f32.mrf.mxu1  ;;  %v4881_v39 = vmul.f32 %v1779_v45, %v4491_v34 }
 0x26b   : > { %v3616_v32 = vpop.eup %3615  ;;  %v2166_v1 = vadd.f32 %v4770_v25, %v2165_v35  ;;  %2520 = vrot.lane.b32.xlu1 %v2171_v49, %s3634_s23 }
 0x26c   : > { %v1778_v48 = vsel %vm883_vm1, %v3614_v22, %v3616_v32  ;;  %v3618_v4 = vpop.eup %3617 }
 0x26d   : > { %2518 = vrot.lane.b32.xlu0 %v2166_v1, %s3634_s23  ;;  %v4878_v29 = vmul.f32 %v1778_v48, %v4516_v20 }
 0x26f   : > { %v3620_v7 = vpop.eup %3619  ;;  %3354 = vmatprep.mubr.msk.f32.mxu1 %vm303_vm0, %v4878_v29 }
 0x270   : > { %v3284_v47 = vpop.f32.mrf.mxu1  ;;  %3355 = vmatmul.mubr.msk.f32.gmra.mxu1 %vm303_vm0, %v4881_v39  ;;  %v1780_v10 = vsel %vm883_vm1, %v3618_v4, %v3620_v7  ;;  %v3622_v3 = vpop.eup %3621 }
 0x271   : > { %v2181_v12 = vadd.f32 %v3284_v47, %v4770_v25  ;;  %v4891_v20 = vmul.f32 %v1780_v10, %v4527_v0 }
 0x272   : > { %v2175_v55 = vpop.f32.mrf.mxu1 }
 0x273   : > { %v3624_v34 = vpop.eup %3623  ;;  %v2176_v5 = vadd.f32 %v4770_v25, %v2175_v55  ;;  %2524 = vrot.lane.b32.xlu1 %v2181_v12, %s3634_s23  ;;  %3357 = vmatprep.mubr.msk.f32.mxu1 %vm303_vm0, %v4891_v20 }
 0x274   : > { %v1781_v49 = vsel %vm883_vm1, %v3622_v3, %v3624_v34 }
 0x275   : > { %2522 = vrot.lane.b32.xlu0 %v2176_v5, %s3634_s23  ;;  %v4901_v22 = vmul.f32 %v1781_v49, %v4548_v42 }
 0x277   : > { %3358 = vmatmul.mubr.msk.f32.gmra.mxu1 %vm303_vm0, %v4901_v22 }
 0x278   : > { %v3287_v0 = vpop.f32.mrf.mxu1 }
 0x279   : > { %v2191_v35 = vadd.f32 %v3287_v0, %v4770_v25 }
 0x27a   : > { %v2185_v32 = vpop.f32.mrf.mxu1 }
 0x27b   : > { %v2186_v1 = vadd.f32 %v4770_v25, %v2185_v32  ;;  %2528 = vrot.lane.b32.xlu1 %v2191_v35, %s3634_s23 }
 0x27d   : > { %2526 = vrot.lane.b32.xlu0 %v2186_v1, %s3634_s23 }
 0x280   : > { %v3290_v6 = vpop.f32.mrf.mxu1 }
 0x281   : > { %v2201_v45 = vadd.f32 %v3290_v6, %v4770_v25 }
 0x282   : > { %v2195_v48 = vpop.f32.mrf.mxu1 }
 0x283   : > { %v2196_v42 = vadd.f32 %v4770_v25, %v2195_v48  ;;  %2532 = vrot.lane.b32.xlu1 %v2201_v45, %s3634_s23 }
 0x285   : > { %2530 = vrot.lane.b32.xlu0 %v2196_v42, %s3634_s23 }
 0x288   : > { %v3293_v4 = vpop.f32.mrf.mxu1 }
 0x289   : > { %v2211_v7 = vadd.f32 %v3293_v4, %v4770_v25 }
 0x28a   : > { %v2205_v47 = vpop.f32.mrf.mxu1 }
 0x28b   : > { %v2206_v10 = vadd.f32 %v4770_v25, %v2205_v47  ;;  %2536 = vrot.lane.b32.xlu1 %v2211_v7, %s3634_s23 }
 0x28d   : > { %2534 = vrot.lane.b32.xlu0 %v2206_v10, %s3634_s23 }
 0x290   : > { %v3296_v12 = vpop.f32.mrf.mxu1 }
 0x291   : > { %v2221_v3 = vadd.f32 %v3296_v12, %v4770_v25 }
 0x292   : > { %v2215_v55 = vpop.f32.mrf.mxu1 }
 0x293   : > { %v2216_v34 = vadd.f32 %v4770_v25, %v2215_v55  ;;  %2540 = vrot.lane.b32.xlu1 %v2221_v3, %s3634_s23 }
 0x295   : > { %2538 = vrot.lane.b32.xlu0 %v2216_v34, %s3634_s23  ;;  %v5327_v34 = vld [vmem:[#allocation6_spill] sm:$0xff] }
 0x298   : > { %v3299_v5 = vpop.f32.mrf.mxu1 }
 0x299   : > { %v2231_v49 = vadd.f32 %v3299_v5, %v4770_v25 }
 0x29a   : > { %v2225_v0 = vpop.f32.mrf.mxu1 }
 0x29b   : > { %v2226_v35 = vadd.f32 %v4770_v25, %v2225_v0  ;;  %2544 = vrot.lane.b32.xlu1 %v2231_v49, %s3634_s23  ;;  %v5328_v0 = vld [vmem:[#allocation5_spill] sm:$0xff] }
 0x29d   : > { %2542 = vrot.lane.b32.xlu0 %v2226_v35, %s3634_s23 }
 0x2a0   : > { %v3302_v32 = vpop.f32.mrf.mxu1 }
 0x2a1   : > { %v2241_v1 = vadd.f32 %v3302_v32, %v4770_v25 }
 0x2a2   : > { %v2235_v6 = vpop.f32.mrf.mxu1 }
 0x2a3   : > { %v2236_v45 = vadd.f32 %v4770_v25, %v2235_v6  ;;  %2548 = vrot.lane.b32.xlu1 %v2241_v1, %s3634_s23 }
 0x2a5   : > { %2546 = vrot.lane.b32.xlu0 %v2236_v45, %s3634_s23 }
 0x2a8   : > { %v3305_v48 = vpop.f32.mrf.mxu1 }
 0x2a9   : > { %v2251_v42 = vadd.f32 %v3305_v48, %v4770_v25 }
 0x2aa   : > { %v2245_v4 = vpop.f32.mrf.mxu1 }
 0x2ab   : > { %v2246_v7 = vadd.f32 %v4770_v25, %v2245_v4  ;;  %2552 = vrot.lane.b32.xlu1 %v2251_v42, %s3634_s23  ;;  %v5329_v42 = vld [vmem:[#allocation8_spill] sm:$0xff] }
 0x2ad   : > { %2550 = vrot.lane.b32.xlu0 %v2246_v7, %s3634_s23 }
 0x2b0   : > { %v3308_v47 = vpop.f32.mrf.mxu1 }
 0x2b1   : > { %v2261_v10 = vadd.f32 %v3308_v47, %v4770_v25 }
 0x2b2   : > { %v2255_v12 = vpop.f32.mrf.mxu1 }
 0x2b3   : > { %v2256_v3 = vadd.f32 %v4770_v25, %v2255_v12  ;;  %2556 = vrot.lane.b32.xlu1 %v2261_v10, %s3634_s23  ;;  %v5330_v12 = vld [vmem:[#allocation7_spill] sm:$0xff] }
 0x2b5   : > { %v2501_v55 = vpop.permute.xlu1 %2500  ;;  %2554 = vrot.lane.b32.xlu0 %v2256_v3, %s3634_s23 }
 0x2b6   : > { %v2691_v5 = vsel %vm303_vm0, %v5327_v34, %v2501_v55 }
 0x2b7   : > { %2756 = vst.msk [vmem:[%s4941_s27 + $0x8] sm:$0xff] %vm2754_vm2, %v2691_v5  ;;  %v2499_v49 = vpop.permute.xlu0 %2498 }
 0x2b8   : > { %v2690_v35 = vsel %vm303_vm0, %v5328_v0, %v2499_v49  ;;  %v3311_v32 = vpop.f32.mrf.mxu1  ;;  %v5331_v49 = vld [vmem:[#allocation10_spill] sm:$0xff] }
 0x2b9   : > { %2755 = vst.msk [vmem:[%s4941_s27] sm:$0xff] %vm2754_vm2, %v2690_v35  ;;  %v2271_v1 = vadd.f32 %v3311_v32, %v4770_v25  ;;  %v5332_v32 = vld [vmem:[#allocation9_spill] sm:$0xff] }
 0x2ba   : > { %v2265_v6 = vpop.f32.mrf.mxu1 }
 0x2bb   : > { %v2266_v45 = vadd.f32 %v4770_v25, %v2265_v6  ;;  %2560 = vrot.lane.b32.xlu1 %v2271_v1, %s3634_s23 }
 0x2bd   : > { %v2505_v48 = vpop.permute.xlu1 %2504  ;;  %2558 = vrot.lane.b32.xlu0 %v2266_v45, %s3634_s23 }
 0x2be   : > { %v2693_v4 = vsel %vm303_vm0, %v5329_v42, %v2505_v48 }
 0x2bf   : > { %2758 = vst.msk [vmem:[%s4941_s27 + $0x18] sm:$0xff] %vm2754_vm2, %v2693_v4 }
 0x2c0   : > { %v3314_v7 = vpop.f32.mrf.mxu1 }
 0x2c1   : > { %v2281_v47 = vadd.f32 %v3314_v7, %v4770_v25  ;;  %v2503_v10 = vpop.permute.xlu1 %2502  ;;  %v5333_v7 = vld [vmem:[#allocation12_spill] sm:$0xff] }
 0x2c2   : > { %v2692_v3 = vsel %vm303_vm0, %v5330_v12, %v2503_v10  ;;  %v2275_v55 = vpop.f32.mrf.mxu1  ;;  %v5334_v12 = vld [vmem:[#allocation11_spill] sm:$0xff] }
 0x2c3   : > { %2757 = vst.msk [vmem:[%s4941_s27 + $0x10] sm:$0xff] %vm2754_vm2, %v2692_v3  ;;  %v2276_v34 = vadd.f32 %v4770_v25, %v2275_v55  ;;  %2564 = vrot.lane.b32.xlu1 %v2281_v47, %s3634_s23 }
 0x2c5   : > { %v2509_v5 = vpop.permute.xlu1 %2508  ;;  %2562 = vrot.lane.b32.xlu0 %v2276_v34, %s3634_s23 }
 0x2c6   : > { %v2695_v0 = vsel %vm303_vm0, %v5331_v49, %v2509_v5 }
 0x2c7   : > { %2760 = vst.msk [vmem:[%s4941_s27 + $0x28] sm:$0xff] %vm2754_vm2, %v2695_v0  ;;  %v2507_v35 = vpop.permute.xlu0 %2506 }
 0x2c8   : > { %v2694_v1 = vsel %vm303_vm0, %v5332_v32, %v2507_v35  ;;  %v3317_v6 = vpop.f32.mrf.mxu1  ;;  %v5335_v35 = vld [vmem:[#allocation14_spill] sm:$0xff] }
 0x2c9   : > { %2759 = vst.msk [vmem:[%s4941_s27 + $0x20] sm:$0xff] %vm2754_vm2, %v2694_v1  ;;  %v2291_v45 = vadd.f32 %v3317_v6, %v4770_v25  ;;  %v5336_v6 = vld [vmem:[#allocation13_spill] sm:$0xff] }
 0x2ca   : > { %v2285_v48 = vpop.f32.mrf.mxu1 }
 0x2cb   : > { %v2286_v42 = vadd.f32 %v4770_v25, %v2285_v48  ;;  %2568 = vrot.lane.b32.xlu1 %v2291_v45, %s3634_s23 }
 0x2cd   : > { %v2513_v4 = vpop.permute.xlu1 %2512  ;;  %2566 = vrot.lane.b32.xlu0 %v2286_v42, %s3634_s23 }
 0x2ce   : > { %v2697_v47 = vsel %vm303_vm0, %v5333_v7, %v2513_v4 }
 0x2cf   : > { %2762 = vst.msk [vmem:[%s4941_s27 + $0x38] sm:$0xff] %vm2754_vm2, %v2697_v47  ;;  %v2511_v10 = vpop.permute.xlu0 %2510 }
 0x2d0   : > { %v2696_v3 = vsel %vm303_vm0, %v5334_v12, %v2511_v10  ;;  %v3320_v55 = vpop.f32.mrf.mxu1  ;;  %v5337_v10 = vld [vmem:[#allocation16_spill] sm:$0xff] }
 0x2d1   : > { %2761 = vst.msk [vmem:[%s4941_s27 + $0x30] sm:$0xff] %vm2754_vm2, %v2696_v3  ;;  %v2301_v34 = vadd.f32 %v3320_v55, %v4770_v25  ;;  %v5338_v55 = vld [vmem:[#allocation15_spill] sm:$0xff] }
 0x2d2   : > { %v2295_v5 = vpop.f32.mrf.mxu1 }
 0x2d3   : > { %v2296_v49 = vadd.f32 %v4770_v25, %v2295_v5  ;;  %2572 = vrot.lane.b32.xlu1 %v2301_v34, %s3634_s23 }
 0x2d5   : > { %v2517_v0 = vpop.permute.xlu1 %2516  ;;  %2570 = vrot.lane.b32.xlu0 %v2296_v49, %s3634_s23 }
 0x2d6   : > { %v2699_v32 = vsel %vm303_vm0, %v5335_v35, %v2517_v0 }
 0x2d7   : > { %2764 = vst.msk [vmem:[%s4941_s27 + $0x48] sm:$0xff] %vm2754_vm2, %v2699_v32  ;;  %v2515_v1 = vpop.permute.xlu0 %2514 }
 0x2d8   : > { %v2698_v45 = vsel %vm303_vm0, %v5336_v6, %v2515_v1  ;;  %v3323_v48 = vpop.f32.mrf.mxu1  ;;  %v5339_v1 = vld [vmem:[#allocation18_spill] sm:$0xff] }
 0x2d9   : > { %2763 = vst.msk [vmem:[%s4941_s27 + $0x40] sm:$0xff] %vm2754_vm2, %v2698_v45  ;;  %v2311_v42 = vadd.f32 %v3323_v48, %v4770_v25  ;;  %v5340_v48 = vld [vmem:[#allocation17_spill] sm:$0xff] }
 0x2da   : > { %v2305_v4 = vpop.f32.mrf.mxu1 }
 0x2db   : > { %v2306_v7 = vadd.f32 %v4770_v25, %v2305_v4  ;;  %2576 = vrot.lane.b32.xlu1 %v2311_v42, %s3634_s23 }
 0x2dd   : > { %v2521_v47 = vpop.permute.xlu1 %2520  ;;  %2574 = vrot.lane.b32.xlu0 %v2306_v7, %s3634_s23 }
 0x2de   : > { %v2701_v12 = vsel %vm303_vm0, %v5337_v10, %v2521_v47 }
 0x2df   : > { %2766 = vst.msk [vmem:[%s4941_s27 + $0x58] sm:$0xff] %vm2754_vm2, %v2701_v12  ;;  %v2519_v3 = vpop.permute.xlu0 %2518 }
 0x2e0   : > { %v2700_v34 = vsel %vm303_vm0, %v5338_v55, %v2519_v3  ;;  %v3326_v5 = vpop.f32.mrf.mxu1  ;;  %v5341_v3 = vld [vmem:[#allocation21_spill] sm:$0xff] }
 0x2e1   : > { %2765 = vst.msk [vmem:[%s4941_s27 + $0x50] sm:$0xff] %vm2754_vm2, %v2700_v34  ;;  %v2321_v49 = vadd.f32 %v3326_v5, %v4770_v25  ;;  %v5342_v5 = vld [vmem:[#allocation20_spill] sm:$0xff] }
 0x2e2   : > { %v2315_v0 = vpop.f32.mrf.mxu1 }
 0x2e3   : > { %v2316_v35 = vadd.f32 %v4770_v25, %v2315_v0  ;;  %2580 = vrot.lane.b32.xlu1 %v2321_v49, %s3634_s23 }
 0x2e5   : > { %v2525_v32 = vpop.permute.xlu1 %2524  ;;  %2578 = vrot.lane.b32.xlu0 %v2316_v35, %s3634_s23 }
 0x2e6   : > { %v2703_v6 = vsel %vm303_vm0, %v5339_v1, %v2525_v32 }
 0x2e7   : > { %2768 = vst.msk [vmem:[%s4941_s27 + $0x68] sm:$0xff] %vm2754_vm2, %v2703_v6  ;;  %v2523_v45 = vpop.permute.xlu0 %2522 }
 0x2e8   : > { %v2702_v42 = vsel %vm303_vm0, %v5340_v48, %v2523_v45  ;;  %v3329_v4 = vpop.f32.mrf.mxu1  ;;  %v5343_v45 = vld [vmem:[#allocation23_spill] sm:$0xff] }
 0x2e9   : > { %2767 = vst.msk [vmem:[%s4941_s27 + $0x60] sm:$0xff] %vm2754_vm2, %v2702_v42  ;;  %v2331_v7 = vadd.f32 %v3329_v4, %v4770_v25  ;;  %v5344_v4 = vld [vmem:[#allocation22_spill] sm:$0xff] }
 0x2ea   : > { %v2325_v47 = vpop.f32.mrf.mxu1 }
 0x2eb   : > { %v2326_v10 = vadd.f32 %v4770_v25, %v2325_v47  ;;  %2584 = vrot.lane.b32.xlu1 %v2331_v7, %s3634_s23 }
 0x2ed   : > { %v2529_v12 = vpop.permute.xlu1 %2528  ;;  %2582 = vrot.lane.b32.xlu0 %v2326_v10, %s3634_s23 }
 0x2ee   : > { %v2705_v55 = vsel %vm303_vm0, %v5341_v3, %v2529_v12 }
 0x2ef   : > { %2770 = vst.msk [vmem:[%s4941_s27 + $0x78] sm:$0xff] %vm2754_vm2, %v2705_v55  ;;  %v2527_v34 = vpop.permute.xlu0 %2526 }
 0x2f0   : > { %v2704_v49 = vsel %vm303_vm0, %v5342_v5, %v2527_v34  ;;  %v3332_v0 = vpop.f32.mrf.mxu1 }
 0x2f1   : > { %2769 = vst.msk [vmem:[%s4941_s27 + $0x70] sm:$0xff] %vm2754_vm2, %v2704_v49  ;;  %v2341_v35 = vadd.f32 %v3332_v0, %v4770_v25 }
 0x2f2   : > { %v2335_v32 = vpop.f32.mrf.mxu1 }
 0x2f3   : > { %v2336_v1 = vadd.f32 %v4770_v25, %v2335_v32  ;;  %2588 = vrot.lane.b32.xlu1 %v2341_v35, %s3634_s23 }
 0x2f5   : > { %v2533_v6 = vpop.permute.xlu1 %2532  ;;  %2586 = vrot.lane.b32.xlu0 %v2336_v1, %s3634_s23 }
 0x2f6   : > { %v2707_v48 = vsel %vm303_vm0, %v5343_v45, %v2533_v6 }
 0x2f7   : > { %2772 = vst.msk [vmem:[%s4941_s27 + $0x88] sm:$0xff] %vm2754_vm2, %v2707_v48  ;;  %v2531_v42 = vpop.permute.xlu0 %2530 }
 0x2f8   : > { %v2706_v7 = vsel %vm303_vm0, %v5344_v4, %v2531_v42  ;;  %v3335_v47 = vpop.f32.mrf.mxu1 }
 0x2f9   : > { %2771 = vst.msk [vmem:[%s4941_s27 + $0x80] sm:$0xff] %vm2754_vm2, %v2706_v7  ;;  %v2351_v10 = vadd.f32 %v3335_v47, %v4770_v25 }
 0x2fa   : > { %v2345_v12 = vpop.f32.mrf.mxu1 }
 0x2fb   : > { %v2346_v3 = vadd.f32 %v4770_v25, %v2345_v12  ;;  %2592 = vrot.lane.b32.xlu1 %v2351_v10, %s3634_s23 }
 0x2fd   : > { %v2537_v55 = vpop.permute.xlu1 %2536  ;;  %2590 = vrot.lane.b32.xlu0 %v2346_v3, %s3634_s23 }
 0x2fe   : > { %v2709_v34 = vsel %vm303_vm0, %v4536_v46, %v2537_v55 }
 0x2ff   : > { %2774 = vst.msk [vmem:[%s4941_s27 + $0x98] sm:$0xff] %vm2754_vm2, %v2709_v34  ;;  %v2535_v5 = vpop.permute.xlu0 %2534 }
 0x300   : > { %v2708_v49 = vsel %vm303_vm0, %v4531_v28, %v2535_v5  ;;  %v3338_v0 = vpop.f32.mrf.mxu1 }
 0x301   : > { %2773 = vst.msk [vmem:[%s4941_s27 + $0x90] sm:$0xff] %vm2754_vm2, %v2708_v49  ;;  %v2361_v35 = vadd.f32 %v3338_v0, %v4770_v25 }
 0x302   : > { %v2355_v32 = vpop.f32.mrf.mxu1 }
 0x303   : > { %v2356_v1 = vadd.f32 %v4770_v25, %v2355_v32  ;;  %2596 = vrot.lane.b32.xlu1 %v2361_v35, %s3634_s23 }
 0x305   : > { %v2541_v6 = vpop.permute.xlu1 %2540  ;;  %2594 = vrot.lane.b32.xlu0 %v2356_v1, %s3634_s23 }
 0x306   : > { %v2711_v46 = vsel %vm303_vm0, %v4565_v11, %v2541_v6 }
 0x307   : > { %2776 = vst.msk [vmem:[%s4941_s27 + $0xa8] sm:$0xff] %vm2754_vm2, %v2711_v46  ;;  %v2539_v28 = vpop.permute.xlu0 %2538 }
 0x308   : > { %v2710_v45 = vsel %vm303_vm0, %v4560_v41, %v2539_v28  ;;  %v3341_v48 = vpop.f32.mrf.mxu1 }
 0x309   : > { %2775 = vst.msk [vmem:[%s4941_s27 + $0xa0] sm:$0xff] %vm2754_vm2, %v2710_v45  ;;  %v2371_v42 = vadd.f32 %v3341_v48, %v4770_v25 }
 0x30a   : > { %v2365_v4 = vpop.f32.mrf.mxu1 }
 0x30b   : > { %v2366_v7 = vadd.f32 %v4770_v25, %v2365_v4  ;;  %2600 = vrot.lane.b32.xlu1 %v2371_v42, %s3634_s23 }
 0x30d   : > { %v2545_v47 = vpop.permute.xlu1 %2544  ;;  %2598 = vrot.lane.b32.xlu0 %v2366_v7, %s3634_s23 }
 0x30e   : > { %v2713_v11 = vsel %vm303_vm0, %v4585_v33, %v2545_v47 }
 0x30f   : > { %2778 = vst.msk [vmem:[%s4941_s27 + $0xb8] sm:$0xff] %vm2754_vm2, %v2713_v11  ;;  %v2543_v41 = vpop.permute.xlu0 %2542 }
 0x310   : > { %v2712_v10 = vsel %vm303_vm0, %v4582_v38, %v2543_v41  ;;  %v3344_v12 = vpop.f32.mrf.mxu1 }
 0x311   : > { %2777 = vst.msk [vmem:[%s4941_s27 + $0xb0] sm:$0xff] %vm2754_vm2, %v2712_v10  ;;  %v2381_v3 = vadd.f32 %v3344_v12, %v4770_v25 }
 0x312   : > { %v2375_v55 = vpop.f32.mrf.mxu1 }
 0x313   : > { %v2376_v34 = vadd.f32 %v4770_v25, %v2375_v55  ;;  %2604 = vrot.lane.b32.xlu1 %v2381_v3, %s3634_s23 }
 0x315   : > { %v2549_v5 = vpop.permute.xlu1 %2548  ;;  %2602 = vrot.lane.b32.xlu0 %v2376_v34, %s3634_s23 }
 0x316   : > { %v2715_v33 = vsel %vm303_vm0, %v4600_v43, %v2549_v5 }
 0x317   : > { %2780 = vst.msk [vmem:[%s4941_s27 + $0xc8] sm:$0xff] %vm2754_vm2, %v2715_v33  ;;  %v2547_v38 = vpop.permute.xlu0 %2546 }
 0x318   : > { %v2714_v49 = vsel %vm303_vm0, %v4597_v53, %v2547_v38  ;;  %v3347_v0 = vpop.f32.mrf.mxu1 }
 0x319   : > { %2779 = vst.msk [vmem:[%s4941_s27 + $0xc0] sm:$0xff] %vm2754_vm2, %v2714_v49  ;;  %v2391_v35 = vadd.f32 %v3347_v0, %v4770_v25 }
 0x31a   : > { %v2385_v32 = vpop.f32.mrf.mxu1 }
 0x31b   : > { %v2386_v1 = vadd.f32 %v4770_v25, %v2385_v32  ;;  %2608 = vrot.lane.b32.xlu1 %v2391_v35, %s3634_s23 }
 0x31d   : > { %v2553_v6 = vpop.permute.xlu1 %2552  ;;  %2606 = vrot.lane.b32.xlu0 %v2386_v1, %s3634_s23 }
 0x31e   : > { %v2717_v43 = vsel %vm303_vm0, %v4614_v14, %v2553_v6 }
 0x31f   : > { %2782 = vst.msk [vmem:[%s4941_s27 + $0xd8] sm:$0xff] %vm2754_vm2, %v2717_v43  ;;  %v2551_v53 = vpop.permute.xlu0 %2550 }
 0x320   : > { %v2716_v46 = vsel %vm303_vm0, %v4611_v56, %v2551_v53  ;;  %v3350_v28 = vpop.f32.mrf.mxu1 }
 0x321   : > { %2781 = vst.msk [vmem:[%s4941_s27 + $0xd0] sm:$0xff] %vm2754_vm2, %v2716_v46  ;;  %v2401_v45 = vadd.f32 %v3350_v28, %v4770_v25 }
 0x322   : > { %v2395_v48 = vpop.f32.mrf.mxu1 }
 0x323   : > { %v2396_v42 = vadd.f32 %v4770_v25, %v2395_v48  ;;  %2612 = vrot.lane.b32.xlu1 %v2401_v45, %s3634_s23 }
 0x325   : > { %v2557_v4 = vpop.permute.xlu1 %2556  ;;  %2610 = vrot.lane.b32.xlu0 %v2396_v42, %s3634_s23 }
 0x326   : > { %v2719_v14 = vsel %vm303_vm0, %v4628_v36, %v2557_v4 }
 0x327   : > { %2784 = vst.msk [vmem:[%s4941_s27 + $0xe8] sm:$0xff] %vm2754_vm2, %v2719_v14  ;;  %v2555_v56 = vpop.permute.xlu0 %2554 }
 0x328   : > { %v2718_v7 = vsel %vm303_vm0, %v4625_v16, %v2555_v56  ;;  %v3353_v47 = vpop.f32.mrf.mxu1 }
 0x329   : > { %2783 = vst.msk [vmem:[%s4941_s27 + $0xe0] sm:$0xff] %vm2754_vm2, %v2718_v7  ;;  %v2411_v11 = vadd.f32 %v3353_v47, %v4770_v25 }
 0x32a   : > { %v2405_v41 = vpop.f32.mrf.mxu1 }
 0x32b   : > { %v2406_v10 = vadd.f32 %v4770_v25, %v2405_v41  ;;  %2616 = vrot.lane.b32.xlu1 %v2411_v11, %s3634_s23 }
 0x32d   : > { %v2561_v12 = vpop.permute.xlu1 %2560  ;;  %2614 = vrot.lane.b32.xlu0 %v2406_v10, %s3634_s23 }
 0x32e   : > { %v2721_v36 = vsel %vm303_vm0, %v4642_v63, %v2561_v12 }
 0x32f   : > { %2786 = vst.msk [vmem:[%s4941_s27 + $0xf8] sm:$0xff] %vm2754_vm2, %v2721_v36  ;;  %v2559_v16 = vpop.permute.xlu0 %2558 }
 0x330   : > { %v2720_v3 = vsel %vm303_vm0, %v4639_v60, %v2559_v16  ;;  %v3356_v55 = vpop.f32.mrf.mxu1  ;;  %v5345_v16 = vld [vmem:[#allocation3_spill] sm:$0xff] }
 0x331   : > { %2785 = vst.msk [vmem:[%s4941_s27 + $0xf0] sm:$0xff] %vm2754_vm2, %v2720_v3  ;;  %v2421_v34 = vadd.f32 %v3356_v55, %v4770_v25 }
 0x332   : > { %v2415_v5 = vpop.f32.mrf.mxu1 }
 0x333   : > { %v2416_v33 = vadd.f32 %v4770_v25, %v2415_v5  ;;  %2620 = vrot.lane.b32.xlu1 %v2421_v34, %s3634_s23 }
 0x335   : > { %v2565_v38 = vpop.permute.xlu1 %2564  ;;  %2618 = vrot.lane.b32.xlu0 %v2416_v33, %s3634_s23 }
 0x336   : > { %v2723_v63 = vsel %vm303_vm0, %v4656_v21, %v2565_v38 }
 0x337   : > { %2788 = vst.msk [vmem:[%s4941_s27 + $0x108] sm:$0xff] %vm2754_vm2, %v2723_v63  ;;  %v3359_v60 = vpop.f32.mrf.mxu1  ;;  %v2563_v49 = vpop.permute.xlu0 %2562 }
 0x338   : > { %v2431_v0 = vadd.f32 %v3359_v60, %v4770_v25  ;;  %v2722_v35 = vsel %vm303_vm0, %v4653_v27, %v2563_v49 }
 0x339   : > { %2787 = vst.msk [vmem:[%s4941_s27 + $0x100] sm:$0xff] %vm2754_vm2, %v2722_v35  ;;  %v2425_v32 = vpop.f32.mrf.mxu1 }
 0x33a   : > { %v2426_v1 = vadd.f32 %v4770_v25, %v2425_v32  ;;  %2624 = vrot.lane.b32.xlu1 %v2431_v0, %s3634_s23 }
 0x33c   : > { %2622 = vrot.lane.b32.xlu0 %v2426_v1, %s3634_s23 }
 0x33d   : > { %v2569_v21 = vpop.permute.xlu1 %2568 }
 0x33e   : > { %v2725_v6 = vsel %vm303_vm0, %v4670_v40, %v2569_v21 }
 0x33f   : > { %2790 = vst.msk [vmem:[%s4941_s27 + $0x118] sm:$0xff] %vm2754_vm2, %v2725_v6  ;;  %v2567_v43 = vpop.permute.xlu0 %2566 }
 0x340   : > { %v2724_v27 = vsel %vm303_vm0, %v4667_v61, %v2567_v43 }
 0x341   : > { %2789 = vst.msk [vmem:[%s4941_s27 + $0x110] sm:$0xff] %vm2754_vm2, %v2724_v27 }
 0x345   : > { %v2573_v25 = vpop.permute.xlu1 %2572 }
 0x346   : > { %v2727_v53 = vsel %vm303_vm0, %v4684_v62, %v2573_v25 }
 0x347   : > { %2792 = vst.msk [vmem:[%s4941_s27 + $0x128] sm:$0xff] %vm2754_vm2, %v2727_v53  ;;  %v2571_v46 = vpop.permute.xlu0 %2570 }
 0x348   : > { %v2726_v40 = vsel %vm303_vm0, %v4681_v9, %v2571_v46 }
 0x349   : > { %2791 = vst.msk [vmem:[%s4941_s27 + $0x120] sm:$0xff] %vm2754_vm2, %v2726_v40 }
 0x34d   : > { %v2577_v28 = vpop.permute.xlu1 %2576 }
 0x34e   : > { %v2729_v61 = vsel %vm303_vm0, %v4698_v23, %v2577_v28 }
 0x34f   : > { %2794 = vst.msk [vmem:[%s4941_s27 + $0x138] sm:$0xff] %vm2754_vm2, %v2729_v61  ;;  %v2575_v45 = vpop.permute.xlu0 %2574 }
 0x350   : > { %v2728_v62 = vsel %vm303_vm0, %v4695_v57, %v2575_v45 }
 0x351   : > { %2793 = vst.msk [vmem:[%s4941_s27 + $0x130] sm:$0xff] %vm2754_vm2, %v2728_v62 }
 0x355   : > { %v2581_v48 = vpop.permute.xlu1 %2580 }
 0x356   : > { %v2731_v9 = vsel %vm303_vm0, %v4712_v50, %v2581_v48 }
 0x357   : > { %2796 = vst.msk [vmem:[%s4941_s27 + $0x148] sm:$0xff] %vm2754_vm2, %v2731_v9  ;;  %v2579_v42 = vpop.permute.xlu0 %2578 }
 0x358   : > { %v2730_v23 = vsel %vm303_vm0, %v4709_v54, %v2579_v42 }
 0x359   : > { %2795 = vst.msk [vmem:[%s4941_s27 + $0x140] sm:$0xff] %vm2754_vm2, %v2730_v23 }
 0x35d   : > { %v2585_v4 = vpop.permute.xlu1 %2584 }
 0x35e   : > { %v2733_v57 = vsel %vm303_vm0, %v4726_v59, %v2585_v4 }
 0x35f   : > { %2798 = vst.msk [vmem:[%s4941_s27 + $0x158] sm:$0xff] %vm2754_vm2, %v2733_v57  ;;  %v2583_v14 = vpop.permute.xlu0 %2582 }
 0x360   : > { %v2732_v50 = vsel %vm303_vm0, %v4723_v2, %v2583_v14 }
 0x361   : > { %2797 = vst.msk [vmem:[%s4941_s27 + $0x150] sm:$0xff] %vm2754_vm2, %v2732_v50 }
 0x365   : > { %v2589_v56 = vpop.permute.xlu1 %2588 }
 0x366   : > { %v2735_v54 = vsel %vm303_vm0, %v4740_v51, %v2589_v56 }
 0x367   : > { %2800 = vst.msk [vmem:[%s4941_s27 + $0x168] sm:$0xff] %vm2754_vm2, %v2735_v54  ;;  %v2587_v7 = vpop.permute.xlu0 %2586 }
 0x368   : > { %v2734_v59 = vsel %vm303_vm0, %v4737_v52, %v2587_v7 }
 0x369   : > { %2799 = vst.msk [vmem:[%s4941_s27 + $0x160] sm:$0xff] %vm2754_vm2, %v2734_v59 }
 0x36d   : > { %v2593_v47 = vpop.permute.xlu1 %2592 }
 0x36e   : > { %v2737_v2 = vsel %vm303_vm0, %v4754_v44, %v2593_v47 }
 0x36f   : > { %2802 = vst.msk [vmem:[%s4941_s27 + $0x178] sm:$0xff] %vm2754_vm2, %v2737_v2  ;;  %v2591_v11 = vpop.permute.xlu0 %2590 }
 0x370   : > { %v2736_v51 = vsel %vm303_vm0, %v4751_v24, %v2591_v11 }
 0x371   : > { %2801 = vst.msk [vmem:[%s4941_s27 + $0x170] sm:$0xff] %vm2754_vm2, %v2736_v51 }
 0x375   : > { %v2597_v41 = vpop.permute.xlu1 %2596 }
 0x376   : > { %v2739_v52 = vsel %vm303_vm0, %v4773_v30, %v2597_v41 }
 0x377   : > { %2804 = vst.msk [vmem:[%s4941_s27 + $0x188] sm:$0xff] %vm2754_vm2, %v2739_v52  ;;  %v2595_v10 = vpop.permute.xlu0 %2594 }
 0x378   : > { %v2738_v44 = vsel %vm303_vm0, %v4765_v31, %v2595_v10 }
 0x379   : > { %2803 = vst.msk [vmem:[%s4941_s27 + $0x180] sm:$0xff] %vm2754_vm2, %v2738_v44 }
 0x37d   : > { %v2601_v12 = vpop.permute.xlu1 %2600 }
 0x37e   : > { %v2741_v24 = vsel %vm303_vm0, %v4791_v8, %v2601_v12 }
 0x37f   : > { %2806 = vst.msk [vmem:[%s4941_s27 + $0x198] sm:$0xff] %vm2754_vm2, %v2741_v24  ;;  %v2599_v36 = vpop.permute.xlu0 %2598 }
 0x380   : > { %v2740_v30 = vsel %vm303_vm0, %v5345_v16, %v2599_v36 }
 0x381   : > { %2805 = vst.msk [vmem:[%s4941_s27 + $0x190] sm:$0xff] %vm2754_vm2, %v2740_v30 }
 0x385   : > { %v2605_v3 = vpop.permute.xlu1 %2604 }
 0x386   : > { %v2743_v31 = vsel %vm303_vm0, %v4808_v18, %v2605_v3 }
 0x387   : > { %2808 = vst.msk [vmem:[%s4941_s27 + $0x1a8] sm:$0xff] %vm2754_vm2, %v2743_v31  ;;  %v2603_v55 = vpop.permute.xlu0 %2602 }
 0x388   : > { %v2742_v8 = vsel %vm303_vm0, %v4805_v17, %v2603_v55 }
 0x389   : > { %2807 = vst.msk [vmem:[%s4941_s27 + $0x1a0] sm:$0xff] %vm2754_vm2, %v2742_v8 }
 0x38d   : > { %v2609_v34 = vpop.permute.xlu1 %2608 }
 0x38e   : > { %v2745_v5 = vsel %vm303_vm0, %v4827_v13, %v2609_v34 }
 0x38f   : > { %2810 = vst.msk [vmem:[%s4941_s27 + $0x1b8] sm:$0xff] %vm2754_vm2, %v2745_v5  ;;  %v2607_v33 = vpop.permute.xlu0 %2606 }
 0x390   : > { %v2744_v18 = vsel %vm303_vm0, %v4824_v26, %v2607_v33 }
 0x391   : > { %2809 = vst.msk [vmem:[%s4941_s27 + $0x1b0] sm:$0xff] %vm2754_vm2, %v2744_v18 }
 0x395   : > { %v2613_v38 = vpop.permute.xlu1 %2612 }
 0x396   : > { %v2747_v17 = vsel %vm303_vm0, %v4845_v58, %v2613_v38 }
 0x397   : > { %2812 = vst.msk [vmem:[%s4941_s27 + $0x1c8] sm:$0xff] %vm2754_vm2, %v2747_v17  ;;  %v2611_v63 = vpop.permute.xlu0 %2610 }
 0x398   : > { %v2746_v13 = vsel %vm303_vm0, %v4842_v37, %v2611_v63 }
 0x399   : > { %2811 = vst.msk [vmem:[%s4941_s27 + $0x1c0] sm:$0xff] %vm2754_vm2, %v2746_v13 }
 0x39d   : > { %v2617_v60 = vpop.permute.xlu1 %2616 }
 0x39e   : > { %v2749_v26 = vsel %vm303_vm0, %v4863_v19, %v2617_v60 }
 0x39f   : > { %2814 = vst.msk [vmem:[%s4941_s27 + $0x1d8] sm:$0xff] %vm2754_vm2, %v2749_v26  ;;  %v2615_v49 = vpop.permute.xlu0 %2614 }
 0x3a0   : > { %v2748_v58 = vsel %vm303_vm0, %v4860_v15, %v2615_v49 }
 0x3a1   : > { %2813 = vst.msk [vmem:[%s4941_s27 + $0x1d0] sm:$0xff] %vm2754_vm2, %v2748_v58 }
 0x3a5   : > { %v2621_v0 = vpop.permute.xlu1 %2620 }
 0x3a6   : > { %v2751_v37 = vsel %vm303_vm0, %v4881_v39, %v2621_v0 }
 0x3a7   : > { %2816 = vst.msk [vmem:[%s4941_s27 + $0x1e8] sm:$0xff] %vm2754_vm2, %v2751_v37  ;;  %v2619_v35 = vpop.permute.xlu0 %2618 }
 0x3a8   : > { %v2750_v32 = vsel %vm303_vm0, %v4878_v29, %v2619_v35 }
 0x3a9   : > { %2815 = vst.msk [vmem:[%s4941_s27 + $0x1e0] sm:$0xff] %vm2754_vm2, %v2750_v32 }
 0x3ac   : > { %v2625_v19 = vpop.permute.xlu1 %2624 }
 0x3ad   : > { %v2753_v1 = vsel %vm303_vm0, %v4901_v22, %v2625_v19 }
 0x3ae   : > { %2818 = vst.msk [vmem:[%s4941_s27 + $0x1f8] sm:$0xff] %vm2754_vm2, %v2753_v1  ;;  %v2623_v15 = vpop.permute.xlu0 %2622 }
 0x3af   : > { %v2752_v21 = vsel %vm303_vm0, %v4891_v20, %v2623_v15 }
 0x3b0   : > { %2817 = vst.msk [vmem:[%s4941_s27 + $0x1f0] sm:$0xff] %vm2754_vm2, %v2752_v21 }
 0x3b1 PF: > { %s15_s18 = sadd.s32 1, %s3632_s18  }
 0x3b2   : > { %p12_p4 = scmp.ge.s32.totalorder %s15_s18, 4  }
 0x3b4   :  { %14 = sbr.rel (!%p12_p4) target bundleno = 1 (0x1), region = 70 }

</bundles_post_ra>
